<compile_context>
chip_gen: v5e
topology: v5e:2x2
jax: 0.10.0
libtpu: 0.0.40
codegen_flags: <defaults>
</compile_context>

<pallas_src>
import functools

import numpy as np

import jax
import jax.numpy as jnp
from jax.experimental import pallas as pl
from jax.experimental.pallas import tpu as pltpu


def _round_up(x, m):
    return (x + m - 1) // m * m


# ----------------------------------------------------------------------------
# Fused Pallas kernel: layer1 (outer product) -> layer2 -> layer3 -> tanh.
# All intermediates stay in VMEM scratch (row-major "H x (W*C)" 2-D layout,
# samples stacked along rows).
# ----------------------------------------------------------------------------
def _fused_generator_kernel(x_ref, w1_ref, w2_ref, w3_ref, o_ref,
                            r2_ref, r3_ref, *,
                            n_batch, k1, k2, k3, hp2, hp3, oh2, oh3,
                            compute_dtype):
    # Zero the dilated/padded intermediate buffers (dilation + padding zeros).
    r2_ref[...] = jnp.zeros_like(r2_ref)
    r3_ref[...] = jnp.zeros_like(r3_ref)

    x = x_ref[...]                                      # (n_pad, nz) compute dt

    # ---- Layer 1: 1x1-spatial ConvTranspose == outer product ----------------
    # Row kh of the K1xK1 output (already width-dilated + padded for layer 2)
    # is x @ w1_packed[kh]; it lands at row (k2-1) + 2*kh of sample n's buffer.
    for kh in range(k1):
        y = jnp.dot(x, w1_ref[kh], preferred_element_type=jnp.float32)
        for n in range(n_batch):
            r2_ref[pl.ds(n * hp2 + (k2 - 1) + 2 * kh, 1), :] = y[n:n + 1, :]

    # ---- Layer 2: banded matmuls, accumulate over the k2 kernel rows --------
    for n in range(n_batch):
        acc = jnp.zeros((oh2, r3_ref.shape[1]), jnp.float32)
        for kh in range(k2):
            lhs = r2_ref[pl.ds(n * hp2 + kh, oh2), :].astype(compute_dtype)
            acc = acc + jnp.dot(lhs, w2_ref[kh],
                                preferred_element_type=jnp.float32)
        # Output rows scatter (stride 2) into layer-3's padded input buffer;
        # width dilation/padding is already baked into w2_ref's columns.
        for oh in range(oh2):
            r3_ref[pl.ds(n * hp3 + (k3 - 1) + 2 * oh, 1), :] = acc[oh:oh + 1, :]

    # ---- Layer 3 + fused tanh (f32 accumulate, f32 tanh) ---------------------
    for n in range(n_batch):
        acc = jnp.zeros((oh3, o_ref.shape[1]), jnp.float32)
        for kh in range(k3):
            lhs = r3_ref[pl.ds(n * hp3 + kh, oh3), :].astype(compute_dtype)
            acc = acc + jnp.dot(lhs, w3_ref[kh],
                                preferred_element_type=jnp.float32)
        o_ref[pl.ds(n * oh3, oh3), :] = jnp.tanh(acc).astype(o_ref.dtype)


# ----------------------------------------------------------------------------
# Weight packing (weight-only glue; can be hoisted out of the step function).
# ----------------------------------------------------------------------------
def _pack_generator_weights(w1, w2, w3):
    nz, c1, k1, _ = w1.shape
    c1b, c2, k2, _ = w2.shape
    c2b, c3, k3, _ = w3.shape
    assert c1b == c1 and c2b == c2

    h1 = k1                                  # (1-1)*2 + k1
    h2 = (h1 - 1) * 2 + k2
    h3 = (h2 - 1) * 2 + k3
    hp2 = (h1 - 1) * 2 + 1 + 2 * (k2 - 1)    # layer-2 padded+dilated input size
    hp3 = (h2 - 1) * 2 + 1 + 2 * (k3 - 1)    # layer-3 padded+dilated input size

    # Layer 1: place tap column kw (with its c1 channels) at dilated+padded
    # column (k2-1) + 2*kw of the layer-2 input row layout.
    s1 = np.zeros((hp2, k1), np.float32)
    for kw in range(k1):
        s1[(k2 - 1) + 2 * kw, kw] = 1.0
    w1p = jnp.einsum('cdhk,vk->hcvd', w1, jnp.asarray(s1))
    w1p = w1p.reshape(k1, nz, hp2 * c1)

    # Layers 2/3: banded weight B[kh][w*cin+ci, col(ow)*cout+co]
    #   = flip(w)[ci, co, kh, w-ow]  when 0 <= w-ow < K, else 0.
    # col(ow) optionally embeds the next layer's width dilation + padding.
    def banded(w_t, wp_in, ow_n, col_of_ow, wcols):
        cin, cout, k, _ = w_t.shape
        s = np.zeros((wp_in, wcols, k), np.float32)
        for ow in range(ow_n):
            for kw in range(k):
                s[ow + kw, col_of_ow(ow), kw] = 1.0
        g = jnp.flip(w_t, (2, 3))
        b = jnp.einsum('cdhk,wvk->hwcvd', g, jnp.asarray(s))
        return b.reshape(k, wp_in * cin, wcols * cout)

    w2p = banded(w2, hp2, h2, lambda ow: (k3 - 1) + 2 * ow, hp3)  # -> R3 rows
    w3p = banded(w3, hp3, h3, lambda ow: ow, h3)                  # -> output rows

    dims = dict(nz=nz, c1=c1, c2=c2, c3=c3, k1=k1, k2=k2, k3=k3,
                h2=h2, h3=h3, hp2=hp2, hp3=hp3)
    return (w1p, w2p, w3p), dims


# ----------------------------------------------------------------------------
# Generator forward (matches the PyTorch module), NCHW in / NCHW out.
# ----------------------------------------------------------------------------
def init_generator_params(key, nz, ngf, nc):
    """Deterministic weights with the shapes implied by Generator.__init__."""
    k1, k2, k3 = jax.random.split(key, 3)
    std = 0.02
    w1 = std * jax.random.normal(k1, (nz, ngf * 2, 5, 5), jnp.float32)
    w2 = std * jax.random.normal(k2, (ngf * 2, ngf, 5, 5), jnp.float32)
    w3 = std * jax.random.normal(k3, (ngf, nc, 4, 4), jnp.float32)
    return w1, w2, w3


def generator_forward(x_nchw, params, *, compute_dtype=jnp.bfloat16):
    """x: (N, nz, 1, 1) NCHW -> (N, nc, 28, 28) NCHW."""
    w1, w2, w3 = params
    n, nz_x, hin, win = x_nchw.shape
    assert hin == 1 and win == 1, "DCGAN generator latent must be (N, nz, 1, 1)"

    (w1p, w2p, w3p), d = _pack_generator_weights(w1, w2, w3)
    assert nz_x == d['nz']

    n_pad = _round_up(n, 8)
    x2 = x_nchw.reshape(n, d['nz'])
    x2 = jnp.pad(x2, ((0, n_pad - n), (0, 0))).astype(compute_dtype)

    kernel = functools.partial(
        _fused_generator_kernel,
        n_batch=n, k1=d['k1'], k2=d['k2'], k3=d['k3'],
        hp2=d['hp2'], hp3=d['hp3'], oh2=d['h2'], oh3=d['h3'],
        compute_dtype=compute_dtype)

    out2d = pl.pallas_call(
        kernel,
        out_shape=jax.ShapeDtypeStruct((n * d['h3'], d['h3'] * d['c3']),
                                       jnp.float32),
        in_specs=[pl.BlockSpec(memory_space=pltpu.MemorySpace.VMEM)] * 4,
        out_specs=pl.BlockSpec(memory_space=pltpu.MemorySpace.VMEM),
        scratch_shapes=[
            pltpu.VMEM((n * d['hp2'], d['hp2'] * d['c1']), jnp.float32),
            pltpu.VMEM((n * d['hp3'], d['hp3'] * d['c2']), jnp.float32),
        ],
    )(x2, w1p.astype(compute_dtype), w2p.astype(compute_dtype),
      w3p.astype(compute_dtype))

    out = out2d.reshape(n, d['h3'], d['h3'], d['c3'])   # (N, OH, OW, C)
    return jnp.transpose(out, (0, 3, 1, 2))             # NCHW


# ----------------------------------------------------------------------------
# Independent XLA reference (for validation only).
# ----------------------------------------------------------------------------
def _reference_conv_transpose(x, w_t, stride):
    K = w_t.shape[-1]
    w_conv = jnp.flip(jnp.transpose(w_t, (1, 0, 2, 3)), (2, 3))    # (Cout,Cin,K,K)
    return jax.lax.conv_general_dilated(
        x, w_conv, window_strides=(1, 1),
        padding=[(K - 1, K - 1), (K - 1, K - 1)],
        lhs_dilation=(stride, stride),
        dimension_numbers=("NCHW", "OIHW", "NCHW"))


def _reference_forward(x, params):
    w1, w2, w3 = params
    h = _reference_conv_transpose(x, w1, 2)
    h = _reference_conv_transpose(h, w2, 2)
    return jnp.tanh(_reference_conv_transpose(h, w3, 2))


if __name__ == "__main__":
    # params = {'nz': 8, 'ngf': 4, 'nc': 3}; DCGAN generator input is (N, nz, 1, 1)
    nz, ngf, nc = 8, 4, 3
    batch = 2

    key = jax.random.PRNGKey(0)
    kx, kp = jax.random.split(key)
    x = jax.random.normal(kx, (batch, nz, 1, 1), jnp.float32)
    params = init_generator_params(kp, nz, ngf, nc)

    y_ref = jax.block_until_ready(_reference_forward(x, params))

    # 1) f32-operand path: verifies the restructured (banded) math exactly.
    fwd_f32 = jax.jit(functools.partial(generator_forward,
                                        compute_dtype=jnp.float32))
    y32 = jax.block_until_ready(fwd_f32(x, params))
    # (1-1)*2+5=5 -> (5-1)*2+5=13 -> (13-1)*2+4=28
    assert y32.shape == (batch, nc, 28, 28), y32.shape
    assert jnp.allclose(y32, y_ref, atol=1e-4, rtol=1e-4), \
        float(jnp.max(jnp.abs(y32 - y_ref)))

    # 2) Default bf16-operand / f32-accumulate path (MXU-native).
    fwd = jax.jit(generator_forward)
    y = jax.block_until_ready(fwd(x, params))
    assert y.shape == (batch, nc, 28, 28), y.shape
    assert jnp.allclose(y, y_ref, atol=5e-4, rtol=5e-2), \
        float(jnp.max(jnp.abs(y - y_ref)))

    print("KERNEL_OK")
</pallas_src>

<mosaic_0001>
module attributes {stable_mosaic.version = 11 : i64} {
  func.func @_fused_generator_kernel(%arg0: memref<8x8xf32, #tpu.memory_space<vmem>>, %arg1: memref<5x8x136xf32, #tpu.memory_space<vmem>>, %arg2: memref<5x136x124xf32, #tpu.memory_space<vmem>>, %arg3: memref<4x124x84xf32, #tpu.memory_space<vmem>>, %arg4: memref<56x84xf32, #tpu.memory_space<vmem>>, %arg5: memref<34x136xf32, #tpu.memory_space<vmem>>, %arg6: memref<62x124xf32, #tpu.memory_space<vmem>>) attributes {dimension_semantics = [], scalar_prefetch = 0 : i64, scratch_operands = 2 : i64, tpu.core_type = #tpu.core_type<tc>} {
    %cst = arith.constant 0.000000e+00 : f32
    %0 = vector.broadcast %cst : f32 to vector<34x136xf32>
    %c0 = arith.constant 0 : index
    %c0_0 = arith.constant 0 : index
    %1 = vector.load %arg5[%c0, %c0_0] : memref<34x136xf32, #tpu.memory_space<vmem>>, vector<34x136xf32>
    tpu.vector_store %arg5[%c0, %c0_0], %0 {strides = array<i32>} : memref<34x136xf32, #tpu.memory_space<vmem>>, vector<34x136xf32>,
    %cst_1 = arith.constant 0.000000e+00 : f32
    %2 = vector.broadcast %cst_1 : f32 to vector<62x124xf32>
    %c0_2 = arith.constant 0 : index
    %c0_3 = arith.constant 0 : index
    %3 = vector.load %arg6[%c0_2, %c0_3] : memref<62x124xf32, #tpu.memory_space<vmem>>, vector<62x124xf32>
    tpu.vector_store %arg6[%c0_2, %c0_3], %2 {strides = array<i32>} : memref<62x124xf32, #tpu.memory_space<vmem>>, vector<62x124xf32>,
    %c0_4 = arith.constant 0 : index
    %c0_5 = arith.constant 0 : index
    %4 = vector.load %arg0[%c0_4, %c0_5] : memref<8x8xf32, #tpu.memory_space<vmem>>, vector<8x8xf32>
    %c0_6 = arith.constant 0 : index
    %c0_7 = arith.constant 0 : index
    %c0_8 = arith.constant 0 : index
    %5 = vector.load %arg1[%c0_6, %c0_7, %c0_8] : memref<5x8x136xf32, #tpu.memory_space<vmem>>, vector<1x8x136xf32>
    %6 = vector.shape_cast %5 : vector<1x8x136xf32> to vector<8x136xf32>
    %cst_9 = arith.constant dense<0.000000e+00> : vector<8x136xf32>
    %7 = tpu.matmul %4, %6, %cst_9 {dimension_numbers = #tpu.dot_dimension_numbers<[1], [0], [0], [1], [0, 0, 1, 1], [], []>} : vector<8x8xf32>, vector<8x136xf32>, vector<8x136xf32> -> vector<8x136xf32>
    %8 = vector.extract_strided_slice %7 {offsets = [0, 0], sizes = [1, 136], strides = [1, 1]} : vector<8x136xf32> to vector<1x136xf32>
    %c4 = arith.constant 4 : index
    %c0_10 = arith.constant 0 : index
    %9 = vector.load %arg5[%c4, %c0_10] : memref<34x136xf32, #tpu.memory_space<vmem>>, vector<1x136xf32>
    tpu.vector_store %arg5[%c4, %c0_10], %8 {strides = array<i32>} : memref<34x136xf32, #tpu.memory_space<vmem>>, vector<1x136xf32>,
    %10 = vector.extract_strided_slice %7 {offsets = [1, 0], sizes = [1, 136], strides = [1, 1]} : vector<8x136xf32> to vector<1x136xf32>
    %c21 = arith.constant 21 : index
    %c0_11 = arith.constant 0 : index
    %11 = vector.load %arg5[%c21, %c0_11] : memref<34x136xf32, #tpu.memory_space<vmem>>, vector<1x136xf32>
    tpu.vector_store %arg5[%c21, %c0_11], %10 {strides = array<i32>} : memref<34x136xf32, #tpu.memory_space<vmem>>, vector<1x136xf32>,
    %c1 = arith.constant 1 : index
    %c0_12 = arith.constant 0 : index
    %c0_13 = arith.constant 0 : index
    %12 = vector.load %arg1[%c1, %c0_12, %c0_13] : memref<5x8x136xf32, #tpu.memory_space<vmem>>, vector<1x8x136xf32>
    %13 = vector.shape_cast %12 : vector<1x8x136xf32> to vector<8x136xf32>
    %cst_14 = arith.constant dense<0.000000e+00> : vector<8x136xf32>
    %14 = tpu.matmul %4, %13, %cst_14 {dimension_numbers = #tpu.dot_dimension_numbers<[1], [0], [0], [1], [0, 0, 1, 1], [], []>} : vector<8x8xf32>, vector<8x136xf32>, vector<8x136xf32> -> vector<8x136xf32>
    %15 = vector.extract_strided_slice %14 {offsets = [0, 0], sizes = [1, 136], strides = [1, 1]} : vector<8x136xf32> to vector<1x136xf32>
    %c6 = arith.constant 6 : index
    %c0_15 = arith.constant 0 : index
    %16 = vector.load %arg5[%c6, %c0_15] : memref<34x136xf32, #tpu.memory_space<vmem>>, vector<1x136xf32>
    tpu.vector_store %arg5[%c6, %c0_15], %15 {strides = array<i32>} : memref<34x136xf32, #tpu.memory_space<vmem>>, vector<1x136xf32>,
    %17 = vector.extract_strided_slice %14 {offsets = [1, 0], sizes = [1, 136], strides = [1, 1]} : vector<8x136xf32> to vector<1x136xf32>
    %c23 = arith.constant 23 : index
    %c0_16 = arith.constant 0 : index
    %18 = vector.load %arg5[%c23, %c0_16] : memref<34x136xf32, #tpu.memory_space<vmem>>, vector<1x136xf32>
    tpu.vector_store %arg5[%c23, %c0_16], %17 {strides = array<i32>} : memref<34x136xf32, #tpu.memory_space<vmem>>, vector<1x136xf32>,
    %c2 = arith.constant 2 : index
    %c0_17 = arith.constant 0 : index
    %c0_18 = arith.constant 0 : index
    %19 = vector.load %arg1[%c2, %c0_17, %c0_18] : memref<5x8x136xf32, #tpu.memory_space<vmem>>, vector<1x8x136xf32>
    %20 = vector.shape_cast %19 : vector<1x8x136xf32> to vector<8x136xf32>
    %cst_19 = arith.constant dense<0.000000e+00> : vector<8x136xf32>
    %21 = tpu.matmul %4, %20, %cst_19 {dimension_numbers = #tpu.dot_dimension_numbers<[1], [0], [0], [1], [0, 0, 1, 1], [], []>} : vector<8x8xf32>, vector<8x136xf32>, vector<8x136xf32> -> vector<8x136xf32>
    %22 = vector.extract_strided_slice %21 {offsets = [0, 0], sizes = [1, 136], strides = [1, 1]} : vector<8x136xf32> to vector<1x136xf32>
    %c8 = arith.constant 8 : index
    %c0_20 = arith.constant 0 : index
    %23 = vector.load %arg5[%c8, %c0_20] : memref<34x136xf32, #tpu.memory_space<vmem>>, vector<1x136xf32>
    tpu.vector_store %arg5[%c8, %c0_20], %22 {strides = array<i32>} : memref<34x136xf32, #tpu.memory_space<vmem>>, vector<1x136xf32>,
    %24 = vector.extract_strided_slice %21 {offsets = [1, 0], sizes = [1, 136], strides = [1, 1]} : vector<8x136xf32> to vector<1x136xf32>
    %c25 = arith.constant 25 : index
    %c0_21 = arith.constant 0 : index
    %25 = vector.load %arg5[%c25, %c0_21] : memref<34x136xf32, #tpu.memory_space<vmem>>, vector<1x136xf32>
    tpu.vector_store %arg5[%c25, %c0_21], %24 {strides = array<i32>} : memref<34x136xf32, #tpu.memory_space<vmem>>, vector<1x136xf32>,
    %c3 = arith.constant 3 : index
    %c0_22 = arith.constant 0 : index
    %c0_23 = arith.constant 0 : index
    %26 = vector.load %arg1[%c3, %c0_22, %c0_23] : memref<5x8x136xf32, #tpu.memory_space<vmem>>, vector<1x8x136xf32>
    %27 = vector.shape_cast %26 : vector<1x8x136xf32> to vector<8x136xf32>
    %cst_24 = arith.constant dense<0.000000e+00> : vector<8x136xf32>
    %28 = tpu.matmul %4, %27, %cst_24 {dimension_numbers = #tpu.dot_dimension_numbers<[1], [0], [0], [1], [0, 0, 1, 1], [], []>} : vector<8x8xf32>, vector<8x136xf32>, vector<8x136xf32> -> vector<8x136xf32>
    %29 = vector.extract_strided_slice %28 {offsets = [0, 0], sizes = [1, 136], strides = [1, 1]} : vector<8x136xf32> to vector<1x136xf32>
    %c10 = arith.constant 10 : index
    %c0_25 = arith.constant 0 : index
    %30 = vector.load %arg5[%c10, %c0_25] : memref<34x136xf32, #tpu.memory_space<vmem>>, vector<1x136xf32>
    tpu.vector_store %arg5[%c10, %c0_25], %29 {strides = array<i32>} : memref<34x136xf32, #tpu.memory_space<vmem>>, vector<1x136xf32>,
    %31 = vector.extract_strided_slice %28 {offsets = [1, 0], sizes = [1, 136], strides = [1, 1]} : vector<8x136xf32> to vector<1x136xf32>
    %c27 = arith.constant 27 : index
    %c0_26 = arith.constant 0 : index
    %32 = vector.load %arg5[%c27, %c0_26] : memref<34x136xf32, #tpu.memory_space<vmem>>, vector<1x136xf32>
    tpu.vector_store %arg5[%c27, %c0_26], %31 {strides = array<i32>} : memref<34x136xf32, #tpu.memory_space<vmem>>, vector<1x136xf32>,
    %c4_27 = arith.constant 4 : index
    %c0_28 = arith.constant 0 : index
    %c0_29 = arith.constant 0 : index
    %33 = vector.load %arg1[%c4_27, %c0_28, %c0_29] : memref<5x8x136xf32, #tpu.memory_space<vmem>>, vector<1x8x136xf32>
    %34 = vector.shape_cast %33 : vector<1x8x136xf32> to vector<8x136xf32>
    %cst_30 = arith.constant dense<0.000000e+00> : vector<8x136xf32>
    %35 = tpu.matmul %4, %34, %cst_30 {dimension_numbers = #tpu.dot_dimension_numbers<[1], [0], [0], [1], [0, 0, 1, 1], [], []>} : vector<8x8xf32>, vector<8x136xf32>, vector<8x136xf32> -> vector<8x136xf32>
    %36 = vector.extract_strided_slice %35 {offsets = [0, 0], sizes = [1, 136], strides = [1, 1]} : vector<8x136xf32> to vector<1x136xf32>
    %c12 = arith.constant 12 : index
    %c0_31 = arith.constant 0 : index
    %37 = vector.load %arg5[%c12, %c0_31] : memref<34x136xf32, #tpu.memory_space<vmem>>, vector<1x136xf32>
    tpu.vector_store %arg5[%c12, %c0_31], %36 {strides = array<i32>} : memref<34x136xf32, #tpu.memory_space<vmem>>, vector<1x136xf32>,
    %38 = vector.extract_strided_slice %35 {offsets = [1, 0], sizes = [1, 136], strides = [1, 1]} : vector<8x136xf32> to vector<1x136xf32>
    %c29 = arith.constant 29 : index
    %c0_32 = arith.constant 0 : index
    %39 = vector.load %arg5[%c29, %c0_32] : memref<34x136xf32, #tpu.memory_space<vmem>>, vector<1x136xf32>
    tpu.vector_store %arg5[%c29, %c0_32], %38 {strides = array<i32>} : memref<34x136xf32, #tpu.memory_space<vmem>>, vector<1x136xf32>,
    %cst_33 = arith.constant 0.000000e+00 : f32
    %40 = vector.broadcast %cst_33 : f32 to vector<13x124xf32>
    %c0_34 = arith.constant 0 : index
    %c0_35 = arith.constant 0 : index
    %41 = vector.load %arg5[%c0_34, %c0_35] : memref<34x136xf32, #tpu.memory_space<vmem>>, vector<13x136xf32>
    %c0_36 = arith.constant 0 : index
    %c0_37 = arith.constant 0 : index
    %c0_38 = arith.constant 0 : index
    %42 = vector.load %arg2[%c0_36, %c0_37, %c0_38] : memref<5x136x124xf32, #tpu.memory_space<vmem>>, vector<1x136x124xf32>
    %43 = vector.shape_cast %42 : vector<1x136x124xf32> to vector<136x124xf32>
    %cst_39 = arith.constant dense<0.000000e+00> : vector<13x124xf32>
    %44 = tpu.matmul %41, %43, %cst_39 {dimension_numbers = #tpu.dot_dimension_numbers<[1], [0], [0], [1], [0, 0, 1, 1], [], []>} : vector<13x136xf32>, vector<136x124xf32>, vector<13x124xf32> -> vector<13x124xf32>
    %45 = arith.addf %40, %44 : vector<13x124xf32>
    %c1_40 = arith.constant 1 : index
    %c0_41 = arith.constant 0 : index
    %46 = vector.load %arg5[%c1_40, %c0_41] : memref<34x136xf32, #tpu.memory_space<vmem>>, vector<13x136xf32>
    %c1_42 = arith.constant 1 : index
    %c0_43 = arith.constant 0 : index
    %c0_44 = arith.constant 0 : index
    %47 = vector.load %arg2[%c1_42, %c0_43, %c0_44] : memref<5x136x124xf32, #tpu.memory_space<vmem>>, vector<1x136x124xf32>
    %48 = vector.shape_cast %47 : vector<1x136x124xf32> to vector<136x124xf32>
    %cst_45 = arith.constant dense<0.000000e+00> : vector<13x124xf32>
    %49 = tpu.matmul %46, %48, %cst_45 {dimension_numbers = #tpu.dot_dimension_numbers<[1], [0], [0], [1], [0, 0, 1, 1], [], []>} : vector<13x136xf32>, vector<136x124xf32>, vector<13x124xf32> -> vector<13x124xf32>
    %50 = arith.addf %45, %49 : vector<13x124xf32>
    %c2_46 = arith.constant 2 : index
    %c0_47 = arith.constant 0 : index
    %51 = vector.load %arg5[%c2_46, %c0_47] : memref<34x136xf32, #tpu.memory_space<vmem>>, vector<13x136xf32>
    %c2_48 = arith.constant 2 : index
    %c0_49 = arith.constant 0 : index
    %c0_50 = arith.constant 0 : index
    %52 = vector.load %arg2[%c2_48, %c0_49, %c0_50] : memref<5x136x124xf32, #tpu.memory_space<vmem>>, vector<1x136x124xf32>
    %53 = vector.shape_cast %52 : vector<1x136x124xf32> to vector<136x124xf32>
    %cst_51 = arith.constant dense<0.000000e+00> : vector<13x124xf32>
    %54 = tpu.matmul %51, %53, %cst_51 {dimension_numbers = #tpu.dot_dimension_numbers<[1], [0], [0], [1], [0, 0, 1, 1], [], []>} : vector<13x136xf32>, vector<136x124xf32>, vector<13x124xf32> -> vector<13x124xf32>
    %55 = arith.addf %50, %54 : vector<13x124xf32>
    %c3_52 = arith.constant 3 : index
    %c0_53 = arith.constant 0 : index
    %56 = vector.load %arg5[%c3_52, %c0_53] : memref<34x136xf32, #tpu.memory_space<vmem>>, vector<13x136xf32>
    %c3_54 = arith.constant 3 : index
    %c0_55 = arith.constant 0 : index
    %c0_56 = arith.constant 0 : index
    %57 = vector.load %arg2[%c3_54, %c0_55, %c0_56] : memref<5x136x124xf32, #tpu.memory_space<vmem>>, vector<1x136x124xf32>
    %58 = vector.shape_cast %57 : vector<1x136x124xf32> to vector<136x124xf32>
    %cst_57 = arith.constant dense<0.000000e+00> : vector<13x124xf32>
    %59 = tpu.matmul %56, %58, %cst_57 {dimension_numbers = #tpu.dot_dimension_numbers<[1], [0], [0], [1], [0, 0, 1, 1], [], []>} : vector<13x136xf32>, vector<136x124xf32>, vector<13x124xf32> -> vector<13x124xf32>
    %60 = arith.addf %55, %59 : vector<13x124xf32>
    %c4_58 = arith.constant 4 : index
    %c0_59 = arith.constant 0 : index
    %61 = vector.load %arg5[%c4_58, %c0_59] : memref<34x136xf32, #tpu.memory_space<vmem>>, vector<13x136xf32>
    %c4_60 = arith.constant 4 : index
    %c0_61 = arith.constant 0 : index
    %c0_62 = arith.constant 0 : index
    %62 = vector.load %arg2[%c4_60, %c0_61, %c0_62] : memref<5x136x124xf32, #tpu.memory_space<vmem>>, vector<1x136x124xf32>
    %63 = vector.shape_cast %62 : vector<1x136x124xf32> to vector<136x124xf32>
    %cst_63 = arith.constant dense<0.000000e+00> : vector<13x124xf32>
    %64 = tpu.matmul %61, %63, %cst_63 {dimension_numbers = #tpu.dot_dimension_numbers<[1], [0], [0], [1], [0, 0, 1, 1], [], []>} : vector<13x136xf32>, vector<136x124xf32>, vector<13x124xf32> -> vector<13x124xf32>
    %65 = arith.addf %60, %64 : vector<13x124xf32>
    %66 = vector.extract_strided_slice %65 {offsets = [0, 0], sizes = [1, 124], strides = [1, 1]} : vector<13x124xf32> to vector<1x124xf32>
    %c3_64 = arith.constant 3 : index
    %c0_65 = arith.constant 0 : index
    %67 = vector.load %arg6[%c3_64, %c0_65] : memref<62x124xf32, #tpu.memory_space<vmem>>, vector<1x124xf32>
    tpu.vector_store %arg6[%c3_64, %c0_65], %66 {strides = array<i32>} : memref<62x124xf32, #tpu.memory_space<vmem>>, vector<1x124xf32>,
    %68 = vector.extract_strided_slice %65 {offsets = [1, 0], sizes = [1, 124], strides = [1, 1]} : vector<13x124xf32> to vector<1x124xf32>
    %c5 = arith.constant 5 : index
    %c0_66 = arith.constant 0 : index
    %69 = vector.load %arg6[%c5, %c0_66] : memref<62x124xf32, #tpu.memory_space<vmem>>, vector<1x124xf32>
    tpu.vector_store %arg6[%c5, %c0_66], %68 {strides = array<i32>} : memref<62x124xf32, #tpu.memory_space<vmem>>, vector<1x124xf32>,
    %70 = vector.extract_strided_slice %65 {offsets = [2, 0], sizes = [1, 124], strides = [1, 1]} : vector<13x124xf32> to vector<1x124xf32>
    %c7 = arith.constant 7 : index
    %c0_67 = arith.constant 0 : index
    %71 = vector.load %arg6[%c7, %c0_67] : memref<62x124xf32, #tpu.memory_space<vmem>>, vector<1x124xf32>
    tpu.vector_store %arg6[%c7, %c0_67], %70 {strides = array<i32>} : memref<62x124xf32, #tpu.memory_space<vmem>>, vector<1x124xf32>,
    %72 = vector.extract_strided_slice %65 {offsets = [3, 0], sizes = [1, 124], strides = [1, 1]} : vector<13x124xf32> to vector<1x124xf32>
    %c9 = arith.constant 9 : index
    %c0_68 = arith.constant 0 : index
    %73 = vector.load %arg6[%c9, %c0_68] : memref<62x124xf32, #tpu.memory_space<vmem>>, vector<1x124xf32>
    tpu.vector_store %arg6[%c9, %c0_68], %72 {strides = array<i32>} : memref<62x124xf32, #tpu.memory_space<vmem>>, vector<1x124xf32>,
    %74 = vector.extract_strided_slice %65 {offsets = [4, 0], sizes = [1, 124], strides = [1, 1]} : vector<13x124xf32> to vector<1x124xf32>
    %c11 = arith.constant 11 : index
    %c0_69 = arith.constant 0 : index
    %75 = vector.load %arg6[%c11, %c0_69] : memref<62x124xf32, #tpu.memory_space<vmem>>, vector<1x124xf32>
    tpu.vector_store %arg6[%c11, %c0_69], %74 {strides = array<i32>} : memref<62x124xf32, #tpu.memory_space<vmem>>, vector<1x124xf32>,
    %76 = vector.extract_strided_slice %65 {offsets = [5, 0], sizes = [1, 124], strides = [1, 1]} : vector<13x124xf32> to vector<1x124xf32>
    %c13 = arith.constant 13 : index
    %c0_70 = arith.constant 0 : index
    %77 = vector.load %arg6[%c13, %c0_70] : memref<62x124xf32, #tpu.memory_space<vmem>>, vector<1x124xf32>
    tpu.vector_store %arg6[%c13, %c0_70], %76 {strides = array<i32>} : memref<62x124xf32, #tpu.memory_space<vmem>>, vector<1x124xf32>,
    %78 = vector.extract_strided_slice %65 {offsets = [6, 0], sizes = [1, 124], strides = [1, 1]} : vector<13x124xf32> to vector<1x124xf32>
    %c15 = arith.constant 15 : index
    %c0_71 = arith.constant 0 : index
    %79 = vector.load %arg6[%c15, %c0_71] : memref<62x124xf32, #tpu.memory_space<vmem>>, vector<1x124xf32>
    tpu.vector_store %arg6[%c15, %c0_71], %78 {strides = array<i32>} : memref<62x124xf32, #tpu.memory_space<vmem>>, vector<1x124xf32>,
    %80 = vector.extract_strided_slice %65 {offsets = [7, 0], sizes = [1, 124], strides = [1, 1]} : vector<13x124xf32> to vector<1x124xf32>
    %c17 = arith.constant 17 : index
    %c0_72 = arith.constant 0 : index
    %81 = vector.load %arg6[%c17, %c0_72] : memref<62x124xf32, #tpu.memory_space<vmem>>, vector<1x124xf32>
    tpu.vector_store %arg6[%c17, %c0_72], %80 {strides = array<i32>} : memref<62x124xf32, #tpu.memory_space<vmem>>, vector<1x124xf32>,
    %82 = vector.extract_strided_slice %65 {offsets = [8, 0], sizes = [1, 124], strides = [1, 1]} : vector<13x124xf32> to vector<1x124xf32>
    %c19 = arith.constant 19 : index
    %c0_73 = arith.constant 0 : index
    %83 = vector.load %arg6[%c19, %c0_73] : memref<62x124xf32, #tpu.memory_space<vmem>>, vector<1x124xf32>
    tpu.vector_store %arg6[%c19, %c0_73], %82 {strides = array<i32>} : memref<62x124xf32, #tpu.memory_space<vmem>>, vector<1x124xf32>,
    %84 = vector.extract_strided_slice %65 {offsets = [9, 0], sizes = [1, 124], strides = [1, 1]} : vector<13x124xf32> to vector<1x124xf32>
    %c21_74 = arith.constant 21 : index
    %c0_75 = arith.constant 0 : index
    %85 = vector.load %arg6[%c21_74, %c0_75] : memref<62x124xf32, #tpu.memory_space<vmem>>, vector<1x124xf32>
    tpu.vector_store %arg6[%c21_74, %c0_75], %84 {strides = array<i32>} : memref<62x124xf32, #tpu.memory_space<vmem>>, vector<1x124xf32>,
    %86 = vector.extract_strided_slice %65 {offsets = [10, 0], sizes = [1, 124], strides = [1, 1]} : vector<13x124xf32> to vector<1x124xf32>
    %c23_76 = arith.constant 23 : index
    %c0_77 = arith.constant 0 : index
    %87 = vector.load %arg6[%c23_76, %c0_77] : memref<62x124xf32, #tpu.memory_space<vmem>>, vector<1x124xf32>
    tpu.vector_store %arg6[%c23_76, %c0_77], %86 {strides = array<i32>} : memref<62x124xf32, #tpu.memory_space<vmem>>, vector<1x124xf32>,
    %88 = vector.extract_strided_slice %65 {offsets = [11, 0], sizes = [1, 124], strides = [1, 1]} : vector<13x124xf32> to vector<1x124xf32>
    %c25_78 = arith.constant 25 : index
    %c0_79 = arith.constant 0 : index
    %89 = vector.load %arg6[%c25_78, %c0_79] : memref<62x124xf32, #tpu.memory_space<vmem>>, vector<1x124xf32>
    tpu.vector_store %arg6[%c25_78, %c0_79], %88 {strides = array<i32>} : memref<62x124xf32, #tpu.memory_space<vmem>>, vector<1x124xf32>,
    %90 = vector.extract_strided_slice %65 {offsets = [12, 0], sizes = [1, 124], strides = [1, 1]} : vector<13x124xf32> to vector<1x124xf32>
    %c27_80 = arith.constant 27 : index
    %c0_81 = arith.constant 0 : index
    %91 = vector.load %arg6[%c27_80, %c0_81] : memref<62x124xf32, #tpu.memory_space<vmem>>, vector<1x124xf32>
    tpu.vector_store %arg6[%c27_80, %c0_81], %90 {strides = array<i32>} : memref<62x124xf32, #tpu.memory_space<vmem>>, vector<1x124xf32>,
    %cst_82 = arith.constant 0.000000e+00 : f32
    %92 = vector.broadcast %cst_82 : f32 to vector<13x124xf32>
    %c17_83 = arith.constant 17 : index
    %c0_84 = arith.constant 0 : index
    %93 = vector.load %arg5[%c17_83, %c0_84] : memref<34x136xf32, #tpu.memory_space<vmem>>, vector<13x136xf32>
    %c0_85 = arith.constant 0 : index
    %c0_86 = arith.constant 0 : index
    %c0_87 = arith.constant 0 : index
    %94 = vector.load %arg2[%c0_85, %c0_86, %c0_87] : memref<5x136x124xf32, #tpu.memory_space<vmem>>, vector<1x136x124xf32>
    %95 = vector.shape_cast %94 : vector<1x136x124xf32> to vector<136x124xf32>
    %cst_88 = arith.constant dense<0.000000e+00> : vector<13x124xf32>
    %96 = tpu.matmul %93, %95, %cst_88 {dimension_numbers = #tpu.dot_dimension_numbers<[1], [0], [0], [1], [0, 0, 1, 1], [], []>} : vector<13x136xf32>, vector<136x124xf32>, vector<13x124xf32> -> vector<13x124xf32>
    %97 = arith.addf %92, %96 : vector<13x124xf32>
    %c18 = arith.constant 18 : index
    %c0_89 = arith.constant 0 : index
    %98 = vector.load %arg5[%c18, %c0_89] : memref<34x136xf32, #tpu.memory_space<vmem>>, vector<13x136xf32>
    %c1_90 = arith.constant 1 : index
    %c0_91 = arith.constant 0 : index
    %c0_92 = arith.constant 0 : index
    %99 = vector.load %arg2[%c1_90, %c0_91, %c0_92] : memref<5x136x124xf32, #tpu.memory_space<vmem>>, vector<1x136x124xf32>
    %100 = vector.shape_cast %99 : vector<1x136x124xf32> to vector<136x124xf32>
    %cst_93 = arith.constant dense<0.000000e+00> : vector<13x124xf32>
    %101 = tpu.matmul %98, %100, %cst_93 {dimension_numbers = #tpu.dot_dimension_numbers<[1], [0], [0], [1], [0, 0, 1, 1], [], []>} : vector<13x136xf32>, vector<136x124xf32>, vector<13x124xf32> -> vector<13x124xf32>
    %102 = arith.addf %97, %101 : vector<13x124xf32>
    %c19_94 = arith.constant 19 : index
    %c0_95 = arith.constant 0 : index
    %103 = vector.load %arg5[%c19_94, %c0_95] : memref<34x136xf32, #tpu.memory_space<vmem>>, vector<13x136xf32>
    %c2_96 = arith.constant 2 : index
    %c0_97 = arith.constant 0 : index
    %c0_98 = arith.constant 0 : index
    %104 = vector.load %arg2[%c2_96, %c0_97, %c0_98] : memref<5x136x124xf32, #tpu.memory_space<vmem>>, vector<1x136x124xf32>
    %105 = vector.shape_cast %104 : vector<1x136x124xf32> to vector<136x124xf32>
    %cst_99 = arith.constant dense<0.000000e+00> : vector<13x124xf32>
    %106 = tpu.matmul %103, %105, %cst_99 {dimension_numbers = #tpu.dot_dimension_numbers<[1], [0], [0], [1], [0, 0, 1, 1], [], []>} : vector<13x136xf32>, vector<136x124xf32>, vector<13x124xf32> -> vector<13x124xf32>
    %107 = arith.addf %102, %106 : vector<13x124xf32>
    %c20 = arith.constant 20 : index
    %c0_100 = arith.constant 0 : index
    %108 = vector.load %arg5[%c20, %c0_100] : memref<34x136xf32, #tpu.memory_space<vmem>>, vector<13x136xf32>
    %c3_101 = arith.constant 3 : index
    %c0_102 = arith.constant 0 : index
    %c0_103 = arith.constant 0 : index
    %109 = vector.load %arg2[%c3_101, %c0_102, %c0_103] : memref<5x136x124xf32, #tpu.memory_space<vmem>>, vector<1x136x124xf32>
    %110 = vector.shape_cast %109 : vector<1x136x124xf32> to vector<136x124xf32>
    %cst_104 = arith.constant dense<0.000000e+00> : vector<13x124xf32>
    %111 = tpu.matmul %108, %110, %cst_104 {dimension_numbers = #tpu.dot_dimension_numbers<[1], [0], [0], [1], [0, 0, 1, 1], [], []>} : vector<13x136xf32>, vector<136x124xf32>, vector<13x124xf32> -> vector<13x124xf32>
    %112 = arith.addf %107, %111 : vector<13x124xf32>
    %c21_105 = arith.constant 21 : index
    %c0_106 = arith.constant 0 : index
    %113 = vector.load %arg5[%c21_105, %c0_106] : memref<34x136xf32, #tpu.memory_space<vmem>>, vector<13x136xf32>
    %c4_107 = arith.constant 4 : index
    %c0_108 = arith.constant 0 : index
    %c0_109 = arith.constant 0 : index
    %114 = vector.load %arg2[%c4_107, %c0_108, %c0_109] : memref<5x136x124xf32, #tpu.memory_space<vmem>>, vector<1x136x124xf32>
    %115 = vector.shape_cast %114 : vector<1x136x124xf32> to vector<136x124xf32>
    %cst_110 = arith.constant dense<0.000000e+00> : vector<13x124xf32>
    %116 = tpu.matmul %113, %115, %cst_110 {dimension_numbers = #tpu.dot_dimension_numbers<[1], [0], [0], [1], [0, 0, 1, 1], [], []>} : vector<13x136xf32>, vector<136x124xf32>, vector<13x124xf32> -> vector<13x124xf32>
    %117 = arith.addf %112, %116 : vector<13x124xf32>
    %118 = vector.extract_strided_slice %117 {offsets = [0, 0], sizes = [1, 124], strides = [1, 1]} : vector<13x124xf32> to vector<1x124xf32>
    %c34 = arith.constant 34 : index
    %c0_111 = arith.constant 0 : index
    %119 = vector.load %arg6[%c34, %c0_111] : memref<62x124xf32, #tpu.memory_space<vmem>>, vector<1x124xf32>
    tpu.vector_store %arg6[%c34, %c0_111], %118 {strides = array<i32>} : memref<62x124xf32, #tpu.memory_space<vmem>>, vector<1x124xf32>,
    %120 = vector.extract_strided_slice %117 {offsets = [1, 0], sizes = [1, 124], strides = [1, 1]} : vector<13x124xf32> to vector<1x124xf32>
    %c36 = arith.constant 36 : index
    %c0_112 = arith.constant 0 : index
    %121 = vector.load %arg6[%c36, %c0_112] : memref<62x124xf32, #tpu.memory_space<vmem>>, vector<1x124xf32>
    tpu.vector_store %arg6[%c36, %c0_112], %120 {strides = array<i32>} : memref<62x124xf32, #tpu.memory_space<vmem>>, vector<1x124xf32>,
    %122 = vector.extract_strided_slice %117 {offsets = [2, 0], sizes = [1, 124], strides = [1, 1]} : vector<13x124xf32> to vector<1x124xf32>
    %c38 = arith.constant 38 : index
    %c0_113 = arith.constant 0 : index
    %123 = vector.load %arg6[%c38, %c0_113] : memref<62x124xf32, #tpu.memory_space<vmem>>, vector<1x124xf32>
    tpu.vector_store %arg6[%c38, %c0_113], %122 {strides = array<i32>} : memref<62x124xf32, #tpu.memory_space<vmem>>, vector<1x124xf32>,
    %124 = vector.extract_strided_slice %117 {offsets = [3, 0], sizes = [1, 124], strides = [1, 1]} : vector<13x124xf32> to vector<1x124xf32>
    %c40 = arith.constant 40 : index
    %c0_114 = arith.constant 0 : index
    %125 = vector.load %arg6[%c40, %c0_114] : memref<62x124xf32, #tpu.memory_space<vmem>>, vector<1x124xf32>
    tpu.vector_store %arg6[%c40, %c0_114], %124 {strides = array<i32>} : memref<62x124xf32, #tpu.memory_space<vmem>>, vector<1x124xf32>,
    %126 = vector.extract_strided_slice %117 {offsets = [4, 0], sizes = [1, 124], strides = [1, 1]} : vector<13x124xf32> to vector<1x124xf32>
    %c42 = arith.constant 42 : index
    %c0_115 = arith.constant 0 : index
    %127 = vector.load %arg6[%c42, %c0_115] : memref<62x124xf32, #tpu.memory_space<vmem>>, vector<1x124xf32>
    tpu.vector_store %arg6[%c42, %c0_115], %126 {strides = array<i32>} : memref<62x124xf32, #tpu.memory_space<vmem>>, vector<1x124xf32>,
    %128 = vector.extract_strided_slice %117 {offsets = [5, 0], sizes = [1, 124], strides = [1, 1]} : vector<13x124xf32> to vector<1x124xf32>
    %c44 = arith.constant 44 : index
    %c0_116 = arith.constant 0 : index
    %129 = vector.load %arg6[%c44, %c0_116] : memref<62x124xf32, #tpu.memory_space<vmem>>, vector<1x124xf32>
    tpu.vector_store %arg6[%c44, %c0_116], %128 {strides = array<i32>} : memref<62x124xf32, #tpu.memory_space<vmem>>, vector<1x124xf32>,
    %130 = vector.extract_strided_slice %117 {offsets = [6, 0], sizes = [1, 124], strides = [1, 1]} : vector<13x124xf32> to vector<1x124xf32>
    %c46 = arith.constant 46 : index
    %c0_117 = arith.constant 0 : index
    %131 = vector.load %arg6[%c46, %c0_117] : memref<62x124xf32, #tpu.memory_space<vmem>>, vector<1x124xf32>
    tpu.vector_store %arg6[%c46, %c0_117], %130 {strides = array<i32>} : memref<62x124xf32, #tpu.memory_space<vmem>>, vector<1x124xf32>,
    %132 = vector.extract_strided_slice %117 {offsets = [7, 0], sizes = [1, 124], strides = [1, 1]} : vector<13x124xf32> to vector<1x124xf32>
    %c48 = arith.constant 48 : index
    %c0_118 = arith.constant 0 : index
    %133 = vector.load %arg6[%c48, %c0_118] : memref<62x124xf32, #tpu.memory_space<vmem>>, vector<1x124xf32>
    tpu.vector_store %arg6[%c48, %c0_118], %132 {strides = array<i32>} : memref<62x124xf32, #tpu.memory_space<vmem>>, vector<1x124xf32>,
    %134 = vector.extract_strided_slice %117 {offsets = [8, 0], sizes = [1, 124], strides = [1, 1]} : vector<13x124xf32> to vector<1x124xf32>
    %c50 = arith.constant 50 : index
    %c0_119 = arith.constant 0 : index
    %135 = vector.load %arg6[%c50, %c0_119] : memref<62x124xf32, #tpu.memory_space<vmem>>, vector<1x124xf32>
    tpu.vector_store %arg6[%c50, %c0_119], %134 {strides = array<i32>} : memref<62x124xf32, #tpu.memory_space<vmem>>, vector<1x124xf32>,
    %136 = vector.extract_strided_slice %117 {offsets = [9, 0], sizes = [1, 124], strides = [1, 1]} : vector<13x124xf32> to vector<1x124xf32>
    %c52 = arith.constant 52 : index
    %c0_120 = arith.constant 0 : index
    %137 = vector.load %arg6[%c52, %c0_120] : memref<62x124xf32, #tpu.memory_space<vmem>>, vector<1x124xf32>
    tpu.vector_store %arg6[%c52, %c0_120], %136 {strides = array<i32>} : memref<62x124xf32, #tpu.memory_space<vmem>>, vector<1x124xf32>,
    %138 = vector.extract_strided_slice %117 {offsets = [10, 0], sizes = [1, 124], strides = [1, 1]} : vector<13x124xf32> to vector<1x124xf32>
    %c54 = arith.constant 54 : index
    %c0_121 = arith.constant 0 : index
    %139 = vector.load %arg6[%c54, %c0_121] : memref<62x124xf32, #tpu.memory_space<vmem>>, vector<1x124xf32>
    tpu.vector_store %arg6[%c54, %c0_121], %138 {strides = array<i32>} : memref<62x124xf32, #tpu.memory_space<vmem>>, vector<1x124xf32>,
    %140 = vector.extract_strided_slice %117 {offsets = [11, 0], sizes = [1, 124], strides = [1, 1]} : vector<13x124xf32> to vector<1x124xf32>
    %c56 = arith.constant 56 : index
    %c0_122 = arith.constant 0 : index
    %141 = vector.load %arg6[%c56, %c0_122] : memref<62x124xf32, #tpu.memory_space<vmem>>, vector<1x124xf32>
    tpu.vector_store %arg6[%c56, %c0_122], %140 {strides = array<i32>} : memref<62x124xf32, #tpu.memory_space<vmem>>, vector<1x124xf32>,
    %142 = vector.extract_strided_slice %117 {offsets = [12, 0], sizes = [1, 124], strides = [1, 1]} : vector<13x124xf32> to vector<1x124xf32>
    %c58 = arith.constant 58 : index
    %c0_123 = arith.constant 0 : index
    %143 = vector.load %arg6[%c58, %c0_123] : memref<62x124xf32, #tpu.memory_space<vmem>>, vector<1x124xf32>
    tpu.vector_store %arg6[%c58, %c0_123], %142 {strides = array<i32>} : memref<62x124xf32, #tpu.memory_space<vmem>>, vector<1x124xf32>,
    %cst_124 = arith.constant 0.000000e+00 : f32
    %144 = vector.broadcast %cst_124 : f32 to vector<28x84xf32>
    %c0_125 = arith.constant 0 : index
    %c0_126 = arith.constant 0 : index
    %145 = vector.load %arg6[%c0_125, %c0_126] : memref<62x124xf32, #tpu.memory_space<vmem>>, vector<28x124xf32>
    %c0_127 = arith.constant 0 : index
    %c0_128 = arith.constant 0 : index
    %c0_129 = arith.constant 0 : index
    %146 = vector.load %arg3[%c0_127, %c0_128, %c0_129] : memref<4x124x84xf32, #tpu.memory_space<vmem>>, vector<1x124x84xf32>
    %147 = vector.shape_cast %146 : vector<1x124x84xf32> to vector<124x84xf32>
    %cst_130 = arith.constant dense<0.000000e+00> : vector<28x84xf32>
    %148 = tpu.matmul %145, %147, %cst_130 {dimension_numbers = #tpu.dot_dimension_numbers<[1], [0], [0], [1], [0, 0, 1, 1], [], []>} : vector<28x124xf32>, vector<124x84xf32>, vector<28x84xf32> -> vector<28x84xf32>
    %149 = arith.addf %144, %148 : vector<28x84xf32>
    %c1_131 = arith.constant 1 : index
    %c0_132 = arith.constant 0 : index
    %150 = vector.load %arg6[%c1_131, %c0_132] : memref<62x124xf32, #tpu.memory_space<vmem>>, vector<28x124xf32>
    %c1_133 = arith.constant 1 : index
    %c0_134 = arith.constant 0 : index
    %c0_135 = arith.constant 0 : index
    %151 = vector.load %arg3[%c1_133, %c0_134, %c0_135] : memref<4x124x84xf32, #tpu.memory_space<vmem>>, vector<1x124x84xf32>
    %152 = vector.shape_cast %151 : vector<1x124x84xf32> to vector<124x84xf32>
    %cst_136 = arith.constant dense<0.000000e+00> : vector<28x84xf32>
    %153 = tpu.matmul %150, %152, %cst_136 {dimension_numbers = #tpu.dot_dimension_numbers<[1], [0], [0], [1], [0, 0, 1, 1], [], []>} : vector<28x124xf32>, vector<124x84xf32>, vector<28x84xf32> -> vector<28x84xf32>
    %154 = arith.addf %149, %153 : vector<28x84xf32>
    %c2_137 = arith.constant 2 : index
    %c0_138 = arith.constant 0 : index
    %155 = vector.load %arg6[%c2_137, %c0_138] : memref<62x124xf32, #tpu.memory_space<vmem>>, vector<28x124xf32>
    %c2_139 = arith.constant 2 : index
    %c0_140 = arith.constant 0 : index
    %c0_141 = arith.constant 0 : index
    %156 = vector.load %arg3[%c2_139, %c0_140, %c0_141] : memref<4x124x84xf32, #tpu.memory_space<vmem>>, vector<1x124x84xf32>
    %157 = vector.shape_cast %156 : vector<1x124x84xf32> to vector<124x84xf32>
    %cst_142 = arith.constant dense<0.000000e+00> : vector<28x84xf32>
    %158 = tpu.matmul %155, %157, %cst_142 {dimension_numbers = #tpu.dot_dimension_numbers<[1], [0], [0], [1], [0, 0, 1, 1], [], []>} : vector<28x124xf32>, vector<124x84xf32>, vector<28x84xf32> -> vector<28x84xf32>
    %159 = arith.addf %154, %158 : vector<28x84xf32>
    %c3_143 = arith.constant 3 : index
    %c0_144 = arith.constant 0 : index
    %160 = vector.load %arg6[%c3_143, %c0_144] : memref<62x124xf32, #tpu.memory_space<vmem>>, vector<28x124xf32>
    %c3_145 = arith.constant 3 : index
    %c0_146 = arith.constant 0 : index
    %c0_147 = arith.constant 0 : index
    %161 = vector.load %arg3[%c3_145, %c0_146, %c0_147] : memref<4x124x84xf32, #tpu.memory_space<vmem>>, vector<1x124x84xf32>
    %162 = vector.shape_cast %161 : vector<1x124x84xf32> to vector<124x84xf32>
    %cst_148 = arith.constant dense<0.000000e+00> : vector<28x84xf32>
    %163 = tpu.matmul %160, %162, %cst_148 {dimension_numbers = #tpu.dot_dimension_numbers<[1], [0], [0], [1], [0, 0, 1, 1], [], []>} : vector<28x124xf32>, vector<124x84xf32>, vector<28x84xf32> -> vector<28x84xf32>
    %164 = arith.addf %159, %163 : vector<28x84xf32>
    %165 = math.tanh %164 : vector<28x84xf32>
    %c0_149 = arith.constant 0 : index
    %c0_150 = arith.constant 0 : index
    %166 = vector.load %arg4[%c0_149, %c0_150] : memref<56x84xf32, #tpu.memory_space<vmem>>, vector<28x84xf32>
    tpu.vector_store %arg4[%c0_149, %c0_150], %165 {strides = array<i32>} : memref<56x84xf32, #tpu.memory_space<vmem>>, vector<28x84xf32>,
    %cst_151 = arith.constant 0.000000e+00 : f32
    %167 = vector.broadcast %cst_151 : f32 to vector<28x84xf32>
    %c31 = arith.constant 31 : index
    %c0_152 = arith.constant 0 : index
    %168 = vector.load %arg6[%c31, %c0_152] : memref<62x124xf32, #tpu.memory_space<vmem>>, vector<28x124xf32>
    %c0_153 = arith.constant 0 : index
    %c0_154 = arith.constant 0 : index
    %c0_155 = arith.constant 0 : index
    %169 = vector.load %arg3[%c0_153, %c0_154, %c0_155] : memref<4x124x84xf32, #tpu.memory_space<vmem>>, vector<1x124x84xf32>
    %170 = vector.shape_cast %169 : vector<1x124x84xf32> to vector<124x84xf32>
    %cst_156 = arith.constant dense<0.000000e+00> : vector<28x84xf32>
    %171 = tpu.matmul %168, %170, %cst_156 {dimension_numbers = #tpu.dot_dimension_numbers<[1], [0], [0], [1], [0, 0, 1, 1], [], []>} : vector<28x124xf32>, vector<124x84xf32>, vector<28x84xf32> -> vector<28x84xf32>
    %172 = arith.addf %167, %171 : vector<28x84xf32>
    %c32 = arith.constant 32 : index
    %c0_157 = arith.constant 0 : index
    %173 = vector.load %arg6[%c32, %c0_157] : memref<62x124xf32, #tpu.memory_space<vmem>>, vector<28x124xf32>
    %c1_158 = arith.constant 1 : index
    %c0_159 = arith.constant 0 : index
    %c0_160 = arith.constant 0 : index
    %174 = vector.load %arg3[%c1_158, %c0_159, %c0_160] : memref<4x124x84xf32, #tpu.memory_space<vmem>>, vector<1x124x84xf32>
    %175 = vector.shape_cast %174 : vector<1x124x84xf32> to vector<124x84xf32>
    %cst_161 = arith.constant dense<0.000000e+00> : vector<28x84xf32>
    %176 = tpu.matmul %173, %175, %cst_161 {dimension_numbers = #tpu.dot_dimension_numbers<[1], [0], [0], [1], [0, 0, 1, 1], [], []>} : vector<28x124xf32>, vector<124x84xf32>, vector<28x84xf32> -> vector<28x84xf32>
    %177 = arith.addf %172, %176 : vector<28x84xf32>
    %c33 = arith.constant 33 : index
    %c0_162 = arith.constant 0 : index
    %178 = vector.load %arg6[%c33, %c0_162] : memref<62x124xf32, #tpu.memory_space<vmem>>, vector<28x124xf32>
    %c2_163 = arith.constant 2 : index
    %c0_164 = arith.constant 0 : index
    %c0_165 = arith.constant 0 : index
    %179 = vector.load %arg3[%c2_163, %c0_164, %c0_165] : memref<4x124x84xf32, #tpu.memory_space<vmem>>, vector<1x124x84xf32>
    %180 = vector.shape_cast %179 : vector<1x124x84xf32> to vector<124x84xf32>
    %cst_166 = arith.constant dense<0.000000e+00> : vector<28x84xf32>
    %181 = tpu.matmul %178, %180, %cst_166 {dimension_numbers = #tpu.dot_dimension_numbers<[1], [0], [0], [1], [0, 0, 1, 1], [], []>} : vector<28x124xf32>, vector<124x84xf32>, vector<28x84xf32> -> vector<28x84xf32>
    %182 = arith.addf %177, %181 : vector<28x84xf32>
    %c34_167 = arith.constant 34 : index
    %c0_168 = arith.constant 0 : index
    %183 = vector.load %arg6[%c34_167, %c0_168] : memref<62x124xf32, #tpu.memory_space<vmem>>, vector<28x124xf32>
    %c3_169 = arith.constant 3 : index
    %c0_170 = arith.constant 0 : index
    %c0_171 = arith.constant 0 : index
    %184 = vector.load %arg3[%c3_169, %c0_170, %c0_171] : memref<4x124x84xf32, #tpu.memory_space<vmem>>, vector<1x124x84xf32>
    %185 = vector.shape_cast %184 : vector<1x124x84xf32> to vector<124x84xf32>
    %cst_172 = arith.constant dense<0.000000e+00> : vector<28x84xf32>
    %186 = tpu.matmul %183, %185, %cst_172 {dimension_numbers = #tpu.dot_dimension_numbers<[1], [0], [0], [1], [0, 0, 1, 1], [], []>} : vector<28x124xf32>, vector<124x84xf32>, vector<28x84xf32> -> vector<28x84xf32>
    %187 = arith.addf %182, %186 : vector<28x84xf32>
    %188 = math.tanh %187 : vector<28x84xf32>
    %c28 = arith.constant 28 : index
    %c0_173 = arith.constant 0 : index
    %189 = vector.load %arg4[%c28, %c0_173] : memref<56x84xf32, #tpu.memory_space<vmem>>, vector<28x84xf32>
    tpu.vector_store %arg4[%c28, %c0_173], %188 {strides = array<i32>} : memref<56x84xf32, #tpu.memory_space<vmem>>, vector<28x84xf32>,
    return
  }
}

</mosaic_0001>

<bundles_post_ra>
// kernel: generator_forward.1
= control target key start
LH: loop header
LB: loop body
LE: loop exit
PB: predicated region body
PF: predicated region fallthrough
CT: control target
= control target key end

     0   :  { %vm18_vm0 = vcmask 64512   ;;  %v3482_v21 = vmov 0.0   ;;  %v91_v45 = vlaneseq  ;;  %vm88_vm1 = vcmask 1040384   ;;  %s3477_s1 = inlined_call_operand.vmem [shape: f32[5,8,136], index: 1, kind: input, shape index: {}]   ;;  %s3478_s0 = inlined_call_operand.vmem [shape: f32[8,8], index: 0, kind: input, shape index: {}]   ;;  %s3479_s2 = inlined_call_operand.vmem [shape: f32[5,136,124], index: 2, kind: input, shape index: {}]   ;;  %s3480_s3 = inlined_call_operand.vmem [shape: f32[4,124,84], index: 3, kind: input, shape index: {}]   ;;  %s3481_s4 = inlined_call_operand.vmem [shape: f32[56,84], index: 4, kind: output, shape index: {}]  }
   0x1   :  { %v40_v0 = vld [vmem:[%s3477_s1] sm:$0xff]  ;;  %v41_v1 = vld [vmem:[%s3477_s1 + $0x8] sm:$0xff]  ;;  %v1793_v2 = vld [vmem:[%s3477_s1 + $0x18] sm:$0xff]  ;;  %17 = vst [vmem:[#allocation2] sm:$0xff] %v3482_v21  ;;  %vm389_vm3 = vcmask 1046528   ;;  %vm27_vm4 = vcmask 58368  }
   0x2   :  { %60 = vmatpush.msra.mxu0 %v40_v0  ;;  %80 = vmatpush.msra.mxu1 %v41_v1  ;;  %v39_v3 = vld [vmem:[%s3478_s0] sm:$0xff]  ;;  %v1792_v4 = vld [vmem:[%s3477_s1 + $0x10] sm:$0xff]  ;;  %v1797_v5 = vld [vmem:[%s3477_s1 + $0x28] sm:$0xff]  ;;  %19 = vst.msk [vmem:[#allocation2 + $0x8] sm:$0xff] %vm18_vm0, %v3482_v21  ;;  %vm2407_vm2 = vcmp.lt.s32.totalorder %v91_v45, 136  ;;  %vm704_vm5 = vcmask 1043456  }
   0x3   :  { %144 = vmatpush.msra.mxu3 %v1793_v2  ;;  %1790 = vmatmul.msk.f32.vlgmr.msra.gmra.mxu0 %vm18_vm0, %v39_v3  ;;  %v1796_v6 = vld [vmem:[%s3477_s1 + $0x20] sm:$0xff]  ;;  %v1801_v7 = vld [vmem:[%s3477_s1 + $0x38] sm:$0xff]  ;;  %v1800_v8 = vld [vmem:[%s3477_s1 + $0x30] sm:$0xff]  ;;  %20 = vst [vmem:[#allocation2 + $0x10] sm:$0xff] %v3482_v21  ;;  %vm526_vm6 = vcmask 1045504   ;;  %vm613_vm7 = vcmask 1044480  }
   0x4   :  { %1791 = vmatmul.msk.f32.vlgmr.msra.gmra.mxu1 %vm18_vm0, %v39_v3  ;;  %1795 = vmatmul.msk.f32.vlgmr.msra.gmra.mxu3 %vm18_vm0, %v39_v3  ;;  %v1804_v9 = vld [vmem:[%s3477_s1 + $0x40] sm:$0xff]  ;;  %v1805_v10 = vld [vmem:[%s3477_s1 + $0x48] sm:$0xff]  ;;  %v2183_v11 = vld [vmem:[%s3479_s2 + $0x78] sm:$0xff]  ;;  %21 = vst.msk [vmem:[#allocation2 + $0x18] sm:$0xff] %vm18_vm0, %v3482_v21  ;;  %vm1159_vm8 = vcmask 1042432   ;;  %vm29_vm9 = vcmask 1014784  }
   0x5   :  { %124 = vmatpush.msrb.mxu1 %v1792_v4  ;;  %183 = vmatpush.msrb.mxu0 %v1796_v6  ;;  %v2191_v12 = vld [vmem:[%s3479_s2 + $0x70] sm:$0xff]  ;;  %v2197_v13 = vld [vmem:[%s3479_s2 + $0x68] sm:$0xff]  ;;  %v2204_v14 = vld [vmem:[%s3479_s2 + $0x60] sm:$0xff]  ;;  %22 = vst [vmem:[#allocation2 + $0x20] sm:$0xff] %v3482_v21  ;;  %vm769_vm10 = vcmask 1007616   ;;  %vm771_vm11 = vcmask 1008641  }
   0x6   :  { %262 = vmatpush.msrb.mxu3 %v1801_v7  ;;  %242 = vmatpush.msra.mxu2 %v1800_v8  ;;  %v2210_v15 = vld [vmem:[%s3479_s2 + $0x58] sm:$0xff]  ;;  %v2217_v16 = vld [vmem:[%s3479_s2 + $0x50] sm:$0xff]  ;;  %v2223_v17 = vld [vmem:[%s3479_s2 + $0x48] sm:$0xff]  ;;  %23 = vst.msk [vmem:[#allocation2 + $0x28] sm:$0xff] %vm18_vm0, %v3482_v21  ;;  %vm773_vm12 = vcmask 1009666   ;;  %vm775_vm13 = vcmask 1010691  }
   0x7   :  { %203 = vmatpush.msra.mxu1 %v1797_v5  ;;  %301 = vmatpush.msra.mxu0 %v1804_v9  ;;  %v2229_v18 = vld [vmem:[%s3479_s2 + $0x40] sm:$0xff]  ;;  %v2235_v19 = vld [vmem:[%s3479_s2 + $0x38] sm:$0xff]  ;;  %v2243_v20 = vld [vmem:[%s3479_s2 + $0x30] sm:$0xff]  ;;  %24 = vst [vmem:[#allocation2 + $0x30] sm:$0xff] %v3482_v21  ;;  %vm777_vm14 = vcmask 1011716   ;;  %vm779_vm15 = vcmask 1012741  }
   0x8   :  { %1802 = vmatmul.msk.f32.vlgmr.msra.gmra.mxu2 %vm18_vm0, %v39_v3  ;;  %v2250_v22 = vld [vmem:[%s3479_s2 + $0x28] sm:$0xff]  ;;  %v2259_v23 = vld [vmem:[%s3479_s2 + $0x20] sm:$0xff]  ;;  %v2270_v24 = vld [vmem:[%s3479_s2 + $0x18] sm:$0xff]  ;;  %25 = vst.msk [vmem:[#allocation2 + $0x38] sm:$0xff] %vm18_vm0, %v3482_v21 }
   0x9   :  { %26 = vst [vmem:[#allocation2 + $0x40] sm:$0x3] %v3482_v21  ;;  %v2280_v25 = vld [vmem:[%s3479_s2 + $0x100] sm:$0xff]  ;;  %v2285_v26 = vld [vmem:[%s3479_s2 + $0x10] sm:$0xff]  ;;  %v2292_v27 = vld [vmem:[%s3479_s2 + $0xf8] sm:$0xff] }
   0xa   :  { %3536 = vst [vmem:[#allocation4_spill] sm:$0xff] %v2285_v26  ;;  %402 = vmatpush.msrb.mxu2 %v2280_v25  ;;  %v2297_v28 = vld [vmem:[%s3479_s2 + $0x8] sm:$0xff]  ;;  %v2302_v29 = vld [vmem:[%s3479_s2 + $0xf0] sm:$0xff]  ;;  %v2309_v30 = vld [vmem:[%s3479_s2] sm:$0xff] }
   0xb   :  { %1798 = vmatmul.msk.f32.vlgmr.msrb.gmra.mxu0 %vm18_vm0, %v39_v3  ;;  %3537 = vst [vmem:[#allocation5_spill] sm:$0xff] %v2297_v28  ;;  %v2314_v31 = vld [vmem:[%s3479_s2 + $0x298] sm:$0xff]  ;;  %v2319_v32 = vld [vmem:[%s3479_s2 + $0xe8] sm:$0xff]  ;;  %v2326_v33 = vld [vmem:[%s3479_s2 + $0x290] sm:$0xff] }
   0xc   :  { %1794 = vmatmul.msk.f32.vlgmr.msrb.gmra.mxu1 %vm18_vm0, %v39_v3  ;;  %1803 = vmatmul.msk.f32.vlgmr.msrb.gmra.mxu3 %vm18_vm0, %v39_v3  ;;  %3538 = vst [vmem:[#allocation6_spill] sm:$0xff] %v2309_v30  ;;  %v2334_v34 = vld [vmem:[%s3479_s2 + $0xe0] sm:$0xff]  ;;  %v2346_v36 = vld [vmem:[%s3479_s2 + $0x190] sm:$0xff]  ;;  %v2351_v37 = vld [vmem:[%s3479_s2 + $0x288] sm:$0xff] }
   0xd   :  { %321 = vmatpush.msrb.mxu1 %v1805_v10  ;;  %454 = vmatpush.msrb.mxu0 %v2183_v11  ;;  %v2339_v35 = vld [vmem:[%s3479_s2 + $0x80] sm:$0xff]  ;;  %3539 = vst [vmem:[#allocation7_spill] sm:$0xff] %v2351_v37  ;;  %v2358_v38 = vld [vmem:[%s3479_s2 + $0xd8] sm:$0xff]  ;;  %v2369_v40 = vld [vmem:[%s3479_s2 + $0xd0] sm:$0xff] }
   0xe   :  { %403 = vmatpush.msrb.mxu2 %v2292_v27  ;;  %v2363_v39 = vld [vmem:[%s3479_s2 + $0x280] sm:$0xff]  ;;  %v2374_v41 = vld [vmem:[%s3479_s2 + $0x278] sm:$0xff]  ;;  %v2380_v42 = vld [vmem:[%s3479_s2 + $0xc8] sm:$0xff] }
   0xf   :  { %455 = vmatpush.msrb.mxu0 %v2191_v12  ;;  %3540 = vst [vmem:[#allocation8_spill] sm:$0xff] %v2363_v39  ;;  %v2385_v43 = vld [vmem:[%s3479_s2 + $0x108] sm:$0xff]  ;;  %v2392_v44 = vld [vmem:[%s3479_s2 + $0x270] sm:$0xff]  ;;  %v2400_v48 = vld [vmem:[%s3479_s2 + $0xc0] sm:$0xff] }
  0x10   :  { %404 = vmatpush.msrb.mxu2 %v2302_v29  ;;  %3541 = vst [vmem:[#allocation9_spill] sm:$0xff] %v2374_v41  ;;  %440 = vmatpush.msra.mxu3 %v2385_v43  ;;  %v2405_v49 = vld [vmem:[%s3479_s2 + $0x188] sm:$0xff]  ;;  %v2423_v54 = vld [vmem:[%s3479_s2 + $0xb8] sm:$0xff]  ;;  %v2428_v55 = vld [vmem:[%s3479_s2 + $0x180] sm:$0xff] }
  0x11   :  { %456 = vmatpush.msrb.mxu0 %v2197_v13  ;;  %3542 = vst [vmem:[#allocation10_spill] sm:$0xff] %v2392_v44  ;;  %v2416_v52 = vld [vmem:[%s3479_s2 + $0x268] sm:$0xff]  ;;  %v2437_v56 = vld [vmem:[%s3479_s2 + $0x260] sm:$0xff]  ;;  %v2443_v57 = vld [vmem:[%s3479_s2 + $0xb0] sm:$0xff] }
  0x12   :  { %405 = vmatpush.msrb.mxu2 %v2319_v32  ;;  %539 = vmatpush.msrb.mxu3 %v2405_v49  ;;  %3545 = vst [vmem:[#allocation11_spill] sm:$0xff] %v2416_v52  ;;  %v2448_v58 = vld [vmem:[%s3479_s2 + $0x178] sm:$0xff]  ;;  %v2461_v62 = vld [vmem:[%s3479_s2 + $0xa8] sm:$0xff]  ;;  %v2466_v63 = vld [vmem:[%s3479_s2 + $0x170] sm:$0xff] }
  0x13   :  { %1806 = vmatmul.msk.f32.vlgmr.msra.gmra.mxu0 %vm18_vm0, %v39_v3  ;;  %3546 = vst [vmem:[#allocation12_spill] sm:$0xff] %v2437_v56  ;;  %v2455_v60 = vld [vmem:[%s3479_s2 + $0x258] sm:$0xff]  ;;  %v2473_v2 = vld [vmem:[%s3479_s2 + $0x250] sm:$0xff]  ;;  %v2480_v4 = vld [vmem:[%s3479_s2 + $0xa0] sm:$0xff] }
  0x14   :  { %1799 = vmatmul.msk.f32.vlgmr.msra.gmra.mxu1 %vm18_vm0, %v39_v3  ;;  %457 = vmatpush.msrb.mxu0 %v2204_v14  ;;  %3547 = vst [vmem:[#allocation13_spill] sm:$0xff] %v2448_v58  ;;  %v2485_v5 = vld [vmem:[%s3479_s2 + $0x168] sm:$0xff]  ;;  %v2502_v7 = vld [vmem:[%s3479_s2 + $0x98] sm:$0xff]  ;;  %v2507_v8 = vld [vmem:[%s3479_s2 + $0x160] sm:$0xff] }
  0x15   :  { %406 = vmatpush.msrb.mxu2 %v2334_v34  ;;  %492 = vmatpush.msra.mxu1 %v2339_v35  ;;  %3548 = vst [vmem:[#allocation14_spill] sm:$0xff] %v2455_v60  ;;  %v2494_v6 = vld [vmem:[%s3479_s2 + $0x248] sm:$0xff]  ;;  %v2514_v9 = vld [vmem:[%s3479_s2 + $0x240] sm:$0xff]  ;;  %v2520_v10 = vld [vmem:[%s3479_s2 + $0x90] sm:$0xff] }
  0x16   :  { %458 = vmatpush.msrb.mxu0 %v2210_v15  ;;  %540 = vmatpush.msrb.mxu3 %v2428_v55  ;;  %3549 = vst [vmem:[#allocation15_spill] sm:$0xff] %v2466_v63  ;;  %v2525_v45 = vld [vmem:[%s3479_s2 + $0x158] sm:$0xff]  ;;  %v2558_v21 = vld [vmem:[%s3479_s2 + $0x230] sm:$0xff] }
  0x17   :  { %407 = vmatpush.msrb.mxu2 %v2358_v38  ;;  %3550 = vst [vmem:[#allocation16_spill] sm:$0xff] %v2473_v2 }
  0x18   :  { %459 = vmatpush.msrb.mxu0 %v2217_v16  ;;  %541 = vmatpush.msrb.mxu3 %v2448_v58  ;;  %3551 = vst [vmem:[#allocation17_spill] sm:$0xff] %v2485_v5 }
  0x19   :  { %408 = vmatpush.msrb.mxu2 %v2369_v40  ;;  %3552 = vst [vmem:[#allocation18_spill] sm:$0xff] %v2494_v6 }
  0x1a   :  { %460 = vmatpush.msrb.mxu0 %v2223_v17  ;;  %542 = vmatpush.msrb.mxu3 %v2466_v63  ;;  %3553 = vst [vmem:[#allocation19_spill] sm:$0xff] %v2507_v8 }
  0x1b   :  { %409 = vmatpush.msrb.mxu2 %v2380_v42  ;;  %3554 = vst [vmem:[#allocation20_spill] sm:$0xff] %v2514_v9 }
  0x1c   :  { %1807 = vmatmul.msk.f32.vlgmr.msrb.gmra.mxu1 %vm18_vm0, %v39_v3  ;;  %461 = vmatpush.msrb.mxu0 %v2229_v18  ;;  %3555 = vst [vmem:[#allocation21_spill] sm:$0xff] %v2525_v45 }
  0x1d   :  { %577 = vmatpush.msrb.mxu1 %v2346_v36  ;;  %410 = vmatpush.msrb.mxu2 %v2400_v48  ;;  %3559 = vst [vmem:[#allocation25_spill] sm:$0xff] %v2558_v21 }
  0x1e   :  { %462 = vmatpush.msrb.mxu0 %v2235_v19  ;;  %543 = vmatpush.msrb.mxu3 %v2485_v5 }
  0x1f   :  { %411 = vmatpush.msrb.mxu2 %v2423_v54 }
  0x20   :  { %463 = vmatpush.msrb.mxu0 %v2243_v20  ;;  %544 = vmatpush.msrb.mxu3 %v2507_v8 }
  0x21   :  { %412 = vmatpush.msrb.mxu2 %v2443_v57 }
  0x22   :  { %464 = vmatpush.msrb.mxu0 %v2250_v22  ;;  %545 = vmatpush.msrb.mxu3 %v2525_v45 }
  0x23   :  { %413 = vmatpush.msrb.mxu2 %v2461_v62 }
  0x24   :  { %465 = vmatpush.msrb.mxu0 %v2259_v23 }
  0x25   :  { %414 = vmatpush.msrb.mxu2 %v2480_v4 }
  0x26   :  { %466 = vmatpush.msrb.mxu0 %v2270_v24 }
  0x27   :  { %415 = vmatpush.msrb.mxu2 %v2502_v7 }
  0x28   :  { %467 = vmatpush.msrb.mxu0 %v2285_v26 }
  0x29   :  { %416 = vmatpush.msrb.mxu2 %v2520_v10 }
  0x2a   :  { %468 = vmatpush.msrb.mxu0 %v2297_v28 }
  0x2c   :  { %469 = vmatpush.msrb.mxu0 %v2309_v30  ;;  %v2709_v30 = vld [vmem:[%s3479_s2 + $0x1c0] sm:$0xff] }
  0x2e   :  { %721 = vmatpush.msra.mxu0 %v2314_v31 }
  0x30   :  { %722 = vmatpush.msra.mxu0 %v2326_v33 }
  0x32   :  { %723 = vmatpush.msra.mxu0 %v2351_v37 }
  0x34   :  { %724 = vmatpush.msra.mxu0 %v2363_v39 }
  0x36   :  { %725 = vmatpush.msra.mxu0 %v2374_v41 }
  0x38   :  { %726 = vmatpush.msra.mxu0 %v2392_v44 }
  0x3a   :  { %727 = vmatpush.msra.mxu0 %v2416_v52  ;;  %v2586_v52 = vld [vmem:[%s3479_s2 + $0x208] sm:$0xff] }
  0x3c   :  { %728 = vmatpush.msra.mxu0 %v2437_v56 }
  0x3e   :  { %729 = vmatpush.msra.mxu0 %v2455_v60 }
  0x40   :  { %730 = vmatpush.msra.mxu0 %v2473_v2  ;;  %v2571_v2 = vld [vmem:[%s3479_s2 + $0x148] sm:$0xff] }
  0x41   :  { %3560 = vst [vmem:[#allocation26_spill] sm:$0xff] %v2571_v2 }
  0x42   :  { %731 = vmatpush.msra.mxu0 %v2494_v6 }
  0x44   :  { %732 = vmatpush.msra.mxu0 %v2514_v9  ;;  %v2563_v9 = vld [vmem:[%s3479_s2 + $0x210] sm:$0xff] }
  0x80   :  { %v62_v46 = vpop.f32.mrf.mxu0 }
  0x81   :  { %98 = vst [vmem:[#allocation1] sm:$0xff] %v62_v46  ;;  %v82_v47 = vpop.f32.mrf.mxu1 }
  0x82   :  { %v87_v50 = vrot.slane %v82_v47, 7  ;;  %99 = vst [vmem:[#allocation1 + $0x9] sm:$0xff] %v82_v47  ;;  %v2534_v47 = vld [vmem:[%s3479_s2 + $0x238] sm:$0xff] }
  0x83   :  { %3556 = vst [vmem:[#allocation22_spill] sm:$0xff] %v2534_v47  ;;  %733 = vmatpush.msra.mxu0 %v2534_v47 }
  0x84   :  { %v89_v53 = vsel %vm88_vm1, %v62_v46, %v87_v50 }
  0x85   :  { %96 = vst.msk [vmem:[#allocation2 + $0x4] ss:$8 sm:$0x3] %vm2407_vm2, %v89_v53  ;;  %734 = vmatpush.msra.mxu0 %v2558_v21 }
  0x87   :  { %v146_v59 = vpop.f32.mrf.mxu3 }
  0x88   :  { %v151_v61 = vrot.slane %v146_v59, 7  ;;  %v185_v50 = vpop.f32.mrf.mxu0 }
  0x89   :  { %v101_v0 = vld [vmem:[#allocation1 + $0x1] ss:$9 sm:$0xff]  ;;  %v126_v1 = vpop.f32.mrf.mxu1 }
  0x8a   :  { %158 = vst [vmem:[#allocation1 + $0x9] sm:$0xff] %v146_v59  ;;  %v152_v3 = vsel %vm88_vm1, %v126_v1, %v151_v61  ;;  %v2541_v59 = vld [vmem:[%s3479_s2 + $0x88] sm:$0xff]  ;;  %v2546_v61 = vld [vmem:[%s3479_s2 + $0x150] sm:$0xff] }
  0x8b   :  { %104 = vst.msk [vmem:[#allocation2 + $0x25] ss:$8 sm:$0x3] %vm2407_vm2, %v101_v0  ;;  %417 = vmatpush.msrb.mxu2 %v2541_v59  ;;  %546 = vmatpush.msrb.mxu3 %v2546_v61 }
  0x8c   :  { %155 = vst.msk [vmem:[#allocation2 + $0x6] ss:$8 sm:$0x3] %vm2407_vm2, %v152_v3  ;;  %v2553_v3 = vld [vmem:[%s3479_s2 + $0x218] sm:$0xff] }
  0x8d   :  { %157 = vst [vmem:[#allocation1] sm:$0xff] %v126_v1  ;;  %v244_v1 = vpop.f32.mrf.mxu2  ;;  %664 = vmatpush.msra.mxu2 %v2553_v3  ;;  %547 = vmatpush.msrb.mxu3 %v2571_v2  ;;  %v2657_v2 = vld [vmem:[%s3479_s2 + $0x1e8] sm:$0xff] }
  0x8e   :  { %3557 = vst [vmem:[#allocation23_spill] sm:$0xff] %v2546_v61 }
  0x8f   :  { %v2527_v46 = vpop.f32.mrf.mxu3  ;;  %3558 = vst [vmem:[#allocation24_spill] sm:$0xff] %v2553_v3 }
  0x90   :  { %v269_v53 = vrot.slane %v2527_v46, 7 }
  0x91   :  { %v205_v0 = vpop.f32.mrf.mxu1 }
  0x92   :  { %v210_v47 = vrot.slane %v205_v0, 7  ;;  %v270_v6 = vsel %vm88_vm1, %v244_v1, %v269_v53  ;;  %v2579_v53 = vld [vmem:[%s3479_s2 + $0x228] sm:$0xff] }
  0x93   :  { %v342_v60 = vld [vmem:[#allocation2] sm:$0xff]  ;;  %v343_v56 = vld [vmem:[#allocation2 + $0x8] sm:$0xff]  ;;  %273 = vst.msk [vmem:[#allocation2 + $0x12] ss:$8 sm:$0x3] %vm2407_vm2, %v270_v6  ;;  %735 = vmatpush.msra.mxu0 %v2579_v53  ;;  %v2595_v6 = vld [vmem:[%s3479_s2 + $0x140] sm:$0xff] }
  0x94   :  { %3561 = vst [vmem:[#allocation27_spill] sm:$0xff] %v2579_v53  ;;  %v160_v61 = vld [vmem:[#allocation1 + $0x1] ss:$9 sm:$0xff]  ;;  %v211_v21 = vsel %vm88_vm1, %v185_v50, %v210_v47  ;;  %470 = vmatmul.f32.vlgmr.msrb.gmra.mxu0 %v342_v60  ;;  %1827 = vmatmul.msk.f32.vlgmr.msra.gmra.mxu1 %vm18_vm0, %v343_v56 }
  0x95   :  { %163 = vst.msk [vmem:[#allocation2 + $0x27] ss:$8 sm:$0x3] %vm2407_vm2, %v160_v61  ;;  %626 = vmatpush.msra.mxu1 %v2563_v9  ;;  %v2600_v56 = vld [vmem:[%s3479_s2 + $0x200] sm:$0xff]  ;;  %548 = vmatpush.msrb.mxu3 %v2595_v6  ;;  %v2611_v47 = vld [vmem:[%s3479_s2 + $0x138] sm:$0xff]  ;;  %v2627_v61 = vld [vmem:[%s3479_s2 + $0x130] sm:$0xff] }
  0x96   :  { %3562 = vst [vmem:[#allocation28_spill] sm:$0xff] %v2595_v6  ;;  %v2606_v60 = vld [vmem:[%s3479_s2 + $0x220] sm:$0xff]  ;;  %v363_v44 = vld [vmem:[#allocation2] sm:$0xfe] }
  0x97   :  { %216 = vst [vmem:[#allocation1] sm:$0xff] %v185_v50  ;;  %627 = vmatpush.msra.mxu1 %v2586_v52  ;;  %736 = vmatpush.msra.mxu0 %v2606_v60  ;;  %v2620_v50 = vld [vmem:[%s3479_s2 + $0x1f8] sm:$0xff]  ;;  %v390_v3 = vrot.slane %v363_v44, 1  ;;  %v674_v44 = vld [vmem:[#allocation2] sm:$0xf0] }
  0x98   :  { %3563 = vst [vmem:[#allocation29_spill] sm:$0xff] %v2606_v60  ;;  %549 = vmatpush.msrb.mxu3 %v2611_v47  ;;  %v2632_v60 = vpop.f32.mrf.mxu0 }
  0x99   :  { %3564 = vst [vmem:[#allocation30_spill] sm:$0xff] %v2611_v47  ;;  %948 = vmatpush.msrb.mxu0 %v2339_v35  ;;  %628 = vmatpush.msra.mxu1 %v2600_v56  ;;  %v2643_v35 = vld [vmem:[%s3479_s2 + $0x1f0] sm:$0xff]  ;;  %v2650_v47 = vld [vmem:[%s3479_s2 + $0x120] sm:$0xff] }
  0x9a   :  { %214 = vst.msk [vmem:[#allocation2 + $0x10] ss:$8 sm:$0x3] %vm2407_vm2, %v211_v21  ;;  %v2630_v21 = vpop.f32.mrf.mxu1  ;;  %550 = vmatpush.msrb.mxu3 %v2627_v61 }
  0x9b   :  { %217 = vst [vmem:[#allocation1 + $0x9] sm:$0xff] %v205_v0  ;;  %v2637_v0 = vld [vmem:[%s3479_s2 + $0x128] sm:$0xff]  ;;  %v328_v53 = vrot.slane %v2630_v21, 7  ;;  %629 = vmatpush.msra.mxu1 %v2620_v50 }
  0x9c   :  { %3565 = vst [vmem:[#allocation31_spill] sm:$0xff] %v2627_v61  ;;  %551 = vmatpush.msrb.mxu3 %v2637_v0  ;;  %v2666_v61 = vld [vmem:[%s3479_s2 + $0x118] sm:$0xff] }
  0x9d   :  { %3566 = vst [vmem:[#allocation32_spill] sm:$0xff] %v2637_v0  ;;  %v329_v6 = vsel %vm88_vm1, %v2632_v60, %v328_v53  ;;  %630 = vmatpush.msra.mxu1 %v2643_v35  ;;  %v2671_v53 = vld [vmem:[%s3479_s2 + $0x1e0] sm:$0xff]  ;;  %v2685_v0 = vld [vmem:[%s3479_s2 + $0x1d8] sm:$0xff]  ;;  %vm783_vm1 = vcmask 1014791  }
  0x9e   :  { %3567 = vst [vmem:[#allocation33_spill] sm:$0xff] %v2650_v47  ;;  %552 = vmatpush.msrb.mxu3 %v2650_v47  ;;  %v2693_v47 = vld [vmem:[%s3479_s2 + $0x1d0] sm:$0xff] }
  0x9f   :  { %332 = vst.msk [vmem:[#allocation2 + $0x14] ss:$8 sm:$0x3] %vm2407_vm2, %v329_v6  ;;  %631 = vmatpush.msra.mxu1 %v2657_v2  ;;  %v2678_v6 = vld [vmem:[%s3479_s2 + $0x110] sm:$0xff] }
  0xa0   :  { %3568 = vst [vmem:[#allocation34_spill] sm:$0xff] %v2666_v61  ;;  %553 = vmatpush.msrb.mxu3 %v2666_v61 }
  0xa1   :  { %3569 = vst [vmem:[#allocation35_spill] sm:$0xff] %v2678_v6  ;;  %632 = vmatpush.msra.mxu1 %v2671_v53 }
  0xa2   :  { %v219_v45 = vld [vmem:[#allocation1 + $0x1] ss:$9 sm:$0xff]  ;;  %554 = vmatpush.msrb.mxu3 %v2678_v6 }
  0xa3   :  { %222 = vst.msk [vmem:[#allocation2 + $0x31] ss:$8 sm:$0x3] %vm2407_vm2, %v219_v45  ;;  %633 = vmatpush.msra.mxu1 %v2685_v0  ;;  %v2700_v45 = vld [vmem:[%s3479_s2 + $0x1c8] sm:$0xff] }
  0xa4   :  { %275 = vst [vmem:[#allocation1] sm:$0xff] %v244_v1  ;;  %v364_v1 = vld [vmem:[#allocation2 + $0x8] sm:$0xfe] }
  0xa5   :  { %276 = vst [vmem:[#allocation1 + $0x9] sm:$0xff] %v2527_v46  ;;  %634 = vmatpush.msra.mxu1 %v2693_v47  ;;  %v393_v39 = vrot.slane %v364_v1, 1  ;;  %v501_v1 = vld [vmem:[#allocation2 + $0x8] sm:$0xfc] }
  0xa6   :  { %v344_v61 = vld [vmem:[#allocation2 + $0x10] sm:$0x1f]  ;;  %v345_v46 = vld [vmem:[#allocation2 + $0x18] sm:$0x1f] }
  0xa7   :  { %v365_v8 = vld [vmem:[#allocation2 + $0x10] sm:$0x3f]  ;;  %473 = vmatmul.f32.gmra.mxu0 %v344_v61  ;;  %v366_v5 = vld [vmem:[#allocation2 + $0x18] sm:$0x3f]  ;;  %1828 = vmatmul.msk.f32.gmra.mxu1 %vm18_vm0, %v345_v46  ;;  %v3570_v46 = vmov 0.0  }
  0xa8   :  { %v391_v41 = vrot.slane %v365_v8, 1  ;;  %v2703_v6 = vld [vmem:[#allocation2 + $0x10] sm:$0xff]  ;;  %v394_v63 = vrot.slane %v366_v5, 1  ;;  %v2711_v28 = vld [vmem:[#allocation2 + $0x18] sm:$0x7f]  ;;  %635 = vmatpush.msra.mxu1 %v2700_v45  ;;  %30 = vst.msk [vmem:[#allocation3] sm:$0xff] %vm29_vm9, %v3570_v46 }
  0xa9   :  { %v2718_v8 = vld [vmem:[%s3479_s2 + $0x2a0] sm:$0xff]  ;;  %28 = vst.msk [vmem:[#allocation2 + $0x48] sm:$0x3] %vm27_vm4, %v3570_v46  ;;  %v2726_v5 = vld [vmem:[%s3479_s2 + $0x1b8] sm:$0xff]  ;;  %v531_v26 = vrot.slane %v2711_v28, 2  ;;  %v530_v28 = vrot.slane %v501_v1, 2 }
  0xaa   :  { %v392_v61 = vsel %vm389_vm3, %v390_v3, %v391_v41  ;;  %v395_v37 = vsel %vm389_vm3, %v393_v39, %v394_v63  ;;  %v706_v3 = vrot.slane %v2703_v6, 4  ;;  %636 = vmatpush.msra.mxu1 %v2709_v30  ;;  %v2738_v39 = vld [vmem:[%s3479_s2 + $0x1b0] sm:$0xff]  ;;  %v2771_v1 = vld [vmem:[#allocation2 + $0x18] sm:$0xff]  ;;  %31 = vst.msk [vmem:[#allocation3 + $0x8] sm:$0xff] %vm29_vm9, %v3570_v46  ;;  %vm1512_vm4 = vcmask 683008  }
  0xab   :  { %418 = vmatmul.f32.vlgmr.msrb.gmra.mxu2 %v392_v61  ;;  %1825 = vmatmul.msk.f32.vlgmr.msra.gmra.mxu3 %vm18_vm0, %v395_v37  ;;  %v705_v61 = vrot.slane %v674_v44, 4  ;;  %32 = vst.msk [vmem:[#allocation3 + $0x10] sm:$0xff] %vm29_vm9, %v3570_v46 }
  0xac   :  { %v278_v58 = vld [vmem:[#allocation1 + $0x1] ss:$9 sm:$0xff]  ;;  %848 = vmatpush.msrb.mxu2 %v2280_v25  ;;  %759 = vmatpush.msra.mxu3 %v2718_v8  ;;  %33 = vst.msk [vmem:[#allocation3 + $0x18] sm:$0xff] %vm29_vm9, %v3570_v46 }
  0xad   :  { %281 = vst.msk [vmem:[#allocation2 + $0x33] ss:$8 sm:$0x3] %vm2407_vm2, %v278_v58  ;;  %637 = vmatpush.msra.mxu1 %v2726_v5  ;;  %v2748_v25 = vld [vmem:[%s3479_s2 + $0x1a8] sm:$0xff]  ;;  %v707_v37 = vsel %vm704_vm5, %v705_v61, %v706_v3  ;;  %v532_v58 = vsel %vm526_vm6, %v530_v28, %v531_v26 }
  0xae   :  { %335 = vst [vmem:[#allocation1 + $0x9] sm:$0xff] %v2630_v21  ;;  %849 = vmatpush.msrb.mxu2 %v2292_v27  ;;  %v678_v21 = vld [vmem:[#allocation2 + $0x20] sm:$0x1]  ;;  %v2758_v27 = vld [vmem:[%s3479_s2 + $0x1a0] sm:$0xff] }
  0xaf   :  { %334 = vst [vmem:[#allocation1] sm:$0xff] %v2632_v60  ;;  %638 = vmatpush.msra.mxu1 %v2738_v39  ;;  %737 = vmatmul.f32.vlgmr.msra.gmra.mxu0 %v707_v37  ;;  %v2766_v60 = vld [vmem:[%s3479_s2 + $0x198] sm:$0xff]  ;;  %v711_v44 = vrot.slane %v678_v21, 4  ;;  %v812_v37 = vld [vmem:[#allocation2 + $0x28] sm:$0xfc] }
  0xb0   :  { %1846 = vmatmul.msk.f32.vlgmr.msrb.gmra.mxu1 %vm18_vm0, %v532_v58  ;;  %850 = vmatpush.msrb.mxu2 %v2302_v29  ;;  %v502_v29 = vld [vmem:[#allocation2 + $0x10] sm:$0x7f]  ;;  %v3581_v21 = vld [vmem:[#allocation19_spill] sm:$0xff]  ;;  %34 = vst.msk [vmem:[#allocation3 + $0x20] sm:$0xff] %vm29_vm9, %v3570_v46 }
  0xb1   :  { %639 = vmatpush.msra.mxu1 %v2748_v25  ;;  %1086 = vmatpush.msra.mxu0 %v2563_v9  ;;  %v618_v9 = vrot.slane %v2771_v1, 3  ;;  %v3580_v58 = vld [vmem:[#allocation24_spill] sm:$0xff]  ;;  %35 = vst.msk [vmem:[#allocation3 + $0x28] sm:$0xff] %vm29_vm9, %v3570_v46 }
  0xb2   :  { %851 = vmatpush.msrb.mxu2 %v2319_v32  ;;  %v500_v32 = vld [vmem:[#allocation2] sm:$0xfc]  ;;  %36 = vst.msk [vmem:[#allocation3 + $0x30] sm:$0xff] %vm29_vm9, %v3570_v46 }
  0xb3   :  { %640 = vmatpush.msra.mxu1 %v2758_v27  ;;  %421 = vmatmul.f32.gmra.mxu2 %v391_v41  ;;  %v712_v41 = vsel %vm704_vm5, %v706_v3, %v711_v44  ;;  %v3582_v44 = vld [vmem:[#allocation10_spill] sm:$0xff] }
  0xb4   :  { %1826 = vmatmul.msk.f32.gmra.mxu3 %vm18_vm0, %v394_v63  ;;  %1087 = vmatpush.msra.mxu0 %v2586_v52  ;;  %v588_v63 = vld [vmem:[#allocation2 + $0x8] sm:$0xf8]  ;;  %v528_v52 = vrot.slane %v502_v29, 2  ;;  %v3254_v46 = vld [vmem:[%s3480_s3 + $0x88] sm:$0xff] }
  0xb5   :  { %641 = vmatpush.msra.mxu1 %v2766_v60  ;;  %852 = vmatpush.msrb.mxu2 %v2334_v34  ;;  %v617_v34 = vrot.slane %v588_v63, 3 }
  0xb6   :  { %v337_v61 = vld [vmem:[#allocation1 + $0x1] ss:$9 sm:$0xff]  ;;  %1088 = vmatpush.msra.mxu0 %v2600_v56 }
  0xb7   :  { %340 = vst.msk [vmem:[#allocation2 + $0x35] ss:$8 sm:$0x3] %vm2407_vm2, %v337_v61  ;;  %910 = vmatpush.msrb.mxu1 %v2183_v11  ;;  %853 = vmatpush.msrb.mxu2 %v2358_v38  ;;  %v527_v11 = vrot.slane %v500_v32, 2  ;;  %v619_v51 = vsel %vm613_vm7, %v617_v34, %v618_v9  ;;  %v3583_v61 = vld [vmem:[#allocation21_spill] sm:$0xff]  ;;  %v839_v32 = vrot.slane %v812_v37, 2 }
  0xb8   :  { %740 = vmatmul.f32.gmra.mxu0 %v712_v41  ;;  %1847 = vmatmul.msk.f32.gmra.mxu1 %vm18_vm0, %v531_v26  ;;  %v615_v26 = vrot.slane %v2703_v6, 3  ;;  %v3577_v6 = vld [vmem:[#allocation6_spill] sm:$0xff]  ;;  %v3584_v41 = vld [vmem:[#allocation11_spill] sm:$0xff]  ;;  %vm37_vm2 = vcmask 1012736  }
  0xb9   :  { %911 = vmatpush.msrb.mxu1 %v2191_v12  ;;  %1089 = vmatpush.msra.mxu0 %v2620_v50  ;;  %v529_v38 = vsel %vm526_vm6, %v527_v11, %v528_v52  ;;  %v587_v12 = vld [vmem:[#allocation2] sm:$0xf8]  ;;  %v3586_v11 = vld [vmem:[#allocation12_spill] sm:$0xff]  ;;  %v2931_v37 = vld [vmem:[%s3480_s3 + $0x170] sm:$0xff]  ;;  %3616 = vst [vmem:[#allocation11_spill] sm:$0xff] %v3254_v46 }
  0xba   :  { %854 = vmatpush.msrb.mxu2 %v2369_v40  ;;  %v791_v40 = vld [vmem:[#allocation2 + $0x28] sm:$0xfe] }
  0xbb   :  { %912 = vmatpush.msrb.mxu1 %v2197_v13  ;;  %1090 = vmatpush.msra.mxu0 %v2643_v35  ;;  %v901_v50 = vrot.slane %v791_v40, 1  ;;  %v1042_v40 = vld [vmem:[#allocation2 + $0x28] sm:$0xf0] }
  0xbc   :  { %855 = vmatpush.msrb.mxu2 %v2380_v42  ;;  %555 = vmatmul.f32.vlgmr.msrb.gmra.mxu3 %v529_v38  ;;  %v614_v42 = vrot.slane %v587_v12, 3  ;;  %v3587_v38 = vld [vmem:[#allocation26_spill] sm:$0xff]  ;;  %v3589_v12 = vld [vmem:[#allocation28_spill] sm:$0xff] }
  0xbd   :  { %1865 = vmatmul.msk.f32.vlgmr.msra.gmra.mxu2 %vm18_vm0, %v619_v51  ;;  %913 = vmatpush.msrb.mxu1 %v2204_v14  ;;  %v3588_v51 = vld [vmem:[#allocation14_spill] sm:$0xff] }
  0xbe   :  { %1091 = vmatpush.msra.mxu0 %v2657_v2  ;;  %v793_v13 = vld [vmem:[#allocation2 + $0x38] sm:$0x3f]  ;;  %856 = vmatpush.msrb.mxu2 %v2400_v48  ;;  %v616_v14 = vsel %vm613_vm7, %v614_v42, %v615_v26  ;;  %v679_v2 = vld [vmem:[#allocation2 + $0x28] sm:$0x1]  ;;  %v3592_v42 = vld [vmem:[#allocation18_spill] sm:$0xff] }
  0xbf   :  { %v902_v56 = vrot.slane %v793_v13, 1  ;;  %886 = vmatpush.msrb.mxu3 %v2385_v43  ;;  %914 = vmatpush.msrb.mxu1 %v2210_v15  ;;  %v813_v15 = vld [vmem:[#allocation2 + $0x30] sm:$0x7f]  ;;  %v709_v43 = vrot.slane %v2771_v1, 4  ;;  %v814_v3 = vld [vmem:[#allocation2 + $0x38] sm:$0x7f] }
  0xc0   :  { %1092 = vmatpush.msra.mxu0 %v2671_v53  ;;  %857 = vmatpush.msrb.mxu2 %v2423_v54  ;;  %v837_v54 = vrot.slane %v813_v15, 2  ;;  %v3576_v53 = vld [vmem:[#allocation8_spill] sm:$0xff]  ;;  %v2852_v28 = vld [vmem:[#allocation2 + $0x38] sm:$0xff] }
  0xc1   :  { %915 = vmatpush.msrb.mxu1 %v2217_v16  ;;  %v903_v48 = vsel %vm389_vm3, %v901_v50, %v902_v56  ;;  %v675_v16 = vld [vmem:[#allocation2 + $0x8] sm:$0xf0]  ;;  %v985_v1 = vrot.slane %v2852_v28, 3  ;;  %v1074_v13 = vrot.slane %v2852_v28, 4  ;;  %v1073_v50 = vrot.slane %v1042_v40, 4 }
  0xc2   :  { %1093 = vmatpush.msra.mxu0 %v2685_v0  ;;  %642 = vmatmul.f32.vlgmr.msra.gmra.mxu1 %v616_v14  ;;  %v3574_v0 = vld [vmem:[#allocation5_spill] sm:$0xff]  ;;  %v3593_v14 = vld [vmem:[#allocation31_spill] sm:$0xff] }
  0xc3   :  { %858 = vmatpush.msrb.mxu2 %v2443_v57  ;;  %1905 = vmatmul.msk.f32.vlgmr.msrb.gmra.mxu0 %vm18_vm0, %v903_v48  ;;  %v3594_v48 = vld [vmem:[#allocation20_spill] sm:$0xff]  ;;  %v1075_v15 = vsel %vm704_vm5, %v1073_v50, %v1074_v13  ;;  %v3040_v40 = vld [vmem:[%s3480_s3 + $0x1d0] sm:$0xff]  ;;  %v3062_v50 = vld [vmem:[%s3480_s3 + $0x1c8] sm:$0xff] }
  0xc4   :  { %916 = vmatpush.msrb.mxu1 %v2223_v17  ;;  %1094 = vmatpush.msra.mxu0 %v2693_v47  ;;  %v811_v17 = vld [vmem:[#allocation2 + $0x20] sm:$0xfc]  ;;  %v1045_v47 = vld [vmem:[#allocation2 + $0x40] sm:$0x1] }
  0xc5   :  { %859 = vmatpush.msrb.mxu2 %v2461_v62  ;;  %558 = vmatmul.f32.gmra.mxu3 %v528_v52  ;;  %v836_v57 = vrot.slane %v811_v17, 2  ;;  %v1041_v62 = vld [vmem:[#allocation2 + $0x20] sm:$0xf0]  ;;  %v3585_v52 = vld [vmem:[#allocation23_spill] sm:$0xff] }
  0xc6   :  { %1866 = vmatmul.msk.f32.gmra.mxu2 %vm18_vm0, %v618_v9  ;;  %917 = vmatpush.msrb.mxu1 %v2229_v18  ;;  %v708_v18 = vrot.slane %v675_v16, 4  ;;  %v3595_v16 = vld [vmem:[#allocation32_spill] sm:$0xff]  ;;  %v3596_v17 = vld [vmem:[#allocation22_spill] sm:$0xff] }
  0xc7   :  { %1095 = vmatpush.msra.mxu0 %v2700_v45  ;;  %860 = vmatpush.msrb.mxu2 %v2480_v4  ;;  %v792_v4 = vld [vmem:[#allocation2 + $0x30] sm:$0x3f] }
  0xc8   :  { %918 = vmatpush.msrb.mxu1 %v2235_v19  ;;  %v710_v19 = vsel %vm704_vm5, %v708_v18, %v709_v43  ;;  %v3597_v18 = vld [vmem:[#allocation33_spill] sm:$0xff] }
  0xc9   :  { %1096 = vmatpush.msra.mxu0 %v2709_v30  ;;  %861 = vmatpush.msrb.mxu2 %v2502_v7  ;;  %v838_v30 = vsel %vm526_vm6, %v836_v57, %v837_v54  ;;  %v713_v7 = vrot.slane %v679_v2, 4  ;;  %v3599_v2 = vld [vmem:[#allocation34_spill] sm:$0xff] }
  0xca   :  { %919 = vmatpush.msrb.mxu1 %v2243_v20  ;;  %v2826_v20 = vld [vmem:[#allocation2 + $0x30] sm:$0xff] }
  0xcb   :  { %1097 = vmatpush.msra.mxu0 %v2726_v5  ;;  %645 = vmatmul.f32.gmra.mxu1 %v615_v26  ;;  %v1076_v5 = vrot.slane %v1045_v47, 4  ;;  %v3590_v26 = vld [vmem:[#allocation16_spill] sm:$0xff]  ;;  %v982_v57 = vrot.slane %v2826_v20, 3 }
  0xcc   :  { %862 = vmatpush.msrb.mxu2 %v2520_v10  ;;  %1906 = vmatmul.msk.f32.gmra.mxu0 %vm18_vm0, %v902_v56  ;;  %v790_v10 = vld [vmem:[#allocation2 + $0x20] sm:$0xfe] }
  0xcd   :  { %920 = vmatpush.msrb.mxu1 %v2250_v22  ;;  %1098 = vmatpush.msra.mxu0 %v2738_v39  ;;  %v1071_v22 = vrot.slane %v2826_v20, 4  ;;  %v898_v35 = vrot.slane %v790_v10, 1  ;;  %v3578_v39 = vld [vmem:[#allocation17_spill] sm:$0xff]  ;;  %v3591_v56 = vld [vmem:[#allocation30_spill] sm:$0xff] }
  0xce   :  { %863 = vmatpush.msrb.mxu2 %v2541_v59  ;;  %1884 = vmatmul.msk.f32.vlgmr.msra.gmra.mxu3 %vm18_vm0, %v710_v19  ;;  %v899_v59 = vrot.slane %v792_v4, 1  ;;  %v1134_v19 = vld [vmem:[#allocation2 + $0x20] sm:$0xe0] }
  0xcf   :  { %864 = vmatmul.f32.vlgmr.msrb.gmra.mxu2 %v838_v30  ;;  %921 = vmatpush.msrb.mxu1 %v2259_v23  ;;  %v1070_v23 = vrot.slane %v1041_v62, 4  ;;  %v1077_v29 = vsel %vm704_vm5, %v1071_v22, %v1076_v5  ;;  %v3598_v30 = vld [vmem:[#allocation25_spill] sm:$0xff]  ;;  %v1161_v62 = vrot.slane %v2826_v20, 5  ;;  %v1256_v5 = vld [vmem:[%s3480_s3 + $0x78] sm:$0xf] }
  0xd0   :  { %1031 = vmatpush.msra.mxu2 %v2346_v36  ;;  %1099 = vmatpush.msra.mxu0 %v2748_v25  ;;  %v3571_v36 = vld [vmem:[#allocation4_spill] sm:$0xff]  ;;  %v900_v45 = vsel %vm389_vm3, %v898_v35, %v899_v59  ;;  %v3579_v25 = vld [vmem:[#allocation9_spill] sm:$0xff]  ;;  %vm1508_vm3 = vcmask 687104  }
  0xd1   :  { %993 = vmatpush.msra.mxu3 %v2405_v49  ;;  %922 = vmatpush.msrb.mxu1 %v2270_v24  ;;  %v3572_v49 = vld [vmem:[#allocation13_spill] sm:$0xff]  ;;  %v3573_v24 = vld [vmem:[#allocation7_spill] sm:$0xff] }
  0xd2   :  { %1176 = vmatpush.msrb.mxu2 %v2314_v31  ;;  %1100 = vmatpush.msra.mxu0 %v2758_v27  ;;  %v1072_v31 = vsel %vm704_vm5, %v1070_v23, %v1071_v22  ;;  %v840_v27 = vrot.slane %v814_v3, 2  ;;  %v3600_v23 = vld [vmem:[#allocation27_spill] sm:$0xff]  ;;  %v2005_v3 = vld [vmem:[%s3480_s3 + $0x178] sm:$0xf] }
  0xd3   :  { %994 = vmatpush.msra.mxu3 %v2428_v55  ;;  %923 = vmatpush.msrb.mxu1 %v3571_v36  ;;  %v3575_v55 = vld [vmem:[#allocation15_spill] sm:$0xff] }
  0xd4   :  { %1177 = vmatpush.msrb.mxu2 %v2326_v33  ;;  %1101 = vmatpush.msra.mxu0 %v2766_v60  ;;  %v714_v33 = vsel %vm704_vm5, %v709_v43, %v713_v7  ;;  %v957_v60 = vld [vmem:[#allocation2 + $0x28] sm:$0xf8]  ;;  %v841_v9 = vsel %vm526_vm6, %v839_v32, %v840_v27  ;;  %v956_v43 = vld [vmem:[#allocation2 + $0x20] sm:$0xf8]  ;;  %v1160_v7 = vrot.slane %v1134_v19, 5  ;;  %v2979_v32 = vld [vmem:[%s3480_s3 + $0x160] sm:$0xff] }
  0xd5   :  { %995 = vmatpush.msra.mxu3 %v3572_v49  ;;  %1102 = vmatmul.f32.vlgmr.msra.gmra.mxu0 %v1072_v31  ;;  %v984_v63 = vrot.slane %v957_v60, 3  ;;  %v981_v22 = vrot.slane %v956_v43, 3  ;;  %v3601_v36 = vld [vmem:[#allocation35_spill] sm:$0xff]  ;;  %v3602_v49 = vld [vmem:[#allocation29_spill] sm:$0xff]  ;;  %v3096_v43 = vld [vmem:[%s3480_s3 + $0x38] sm:$0xff] }
  0xd6   :  { %1178 = vmatpush.msrb.mxu2 %v3573_v24  ;;  %924 = vmatpush.msrb.mxu1 %v3574_v0  ;;  %v1162_v31 = vsel %vm1159_vm8, %v1160_v7, %v1161_v62  ;;  %v1135_v0 = vld [vmem:[#allocation2 + $0x28] sm:$0xe0]  ;;  %v3156_v7 = vld [vmem:[%s3480_s3 + $0x1a8] sm:$0xff] }
  0xd7   :  { %996 = vmatpush.msra.mxu3 %v3575_v55  ;;  %867 = vmatmul.f32.gmra.mxu2 %v837_v54  ;;  %v986_v34 = vsel %vm613_vm7, %v984_v63, %v985_v1  ;;  %v1046_v54 = vld [vmem:[#allocation2 + $0x48] sm:$0x1]  ;;  %v983_v10 = vsel %vm613_vm7, %v981_v22, %v982_v57  ;;  %v1164_v55 = vrot.slane %v2852_v28, 5  ;;  %v2991_v63 = vld [vmem:[%s3480_s3 + $0xd8] sm:$0xff]  ;;  %v3139_v22 = vld [vmem:[%s3480_s3 + $0xa8] sm:$0xff]  ;;  %3603 = vst [vmem:[#allocation4_spill] sm:$0xff] %v3156_v7 }
  0xd8   :  { %1179 = vmatpush.msrb.mxu2 %v3576_v53  ;;  %1885 = vmatmul.msk.f32.gmra.mxu3 %vm18_vm0, %v714_v33  ;;  %v1078_v4 = vrot.slane %v1046_v54, 4  ;;  %v1163_v33 = vrot.slane %v1135_v0, 5  ;;  %v1137_v53 = vld [vmem:[#allocation2 + $0x48] sm:$0x3]  ;;  %v3201_v0 = vld [vmem:[%s3480_s3 + $0x118] sm:$0xff] }
  0xd9   :  { %925 = vmatpush.msrb.mxu1 %v3577_v6  ;;  %997 = vmatpush.msra.mxu3 %v3578_v39  ;;  %v2026_v39 = vld [vmem:[%s3480_s3 + $0x1f8] sm:$0xf]  ;;  %v2921_v28 = vld [vmem:[%s3480_s3 + $0xf0] sm:$0xff]  ;;  %3610 = vst [vmem:[#allocation17_spill] sm:$0xff] %v3201_v0 }
  0xda   :  { %926 = vmatmul.f32.vlgmr.msrb.gmra.mxu1 %v900_v45  ;;  %1180 = vmatpush.msrb.mxu2 %v3579_v25  ;;  %v1079_v20 = vsel %vm704_vm5, %v1074_v13, %v1078_v4  ;;  %v1165_v35 = vsel %vm1159_vm8, %v1163_v33, %v1164_v55  ;;  %v1979_v45 = vld [vmem:[%s3480_s3 + $0xf8] sm:$0xf]  ;;  %v2926_v25 = vld [vmem:[%s3480_s3 + $0x70] sm:$0xff]  ;;  %v3045_v13 = vld [vmem:[%s3480_s3 + $0xc8] sm:$0xff] }
  0xdb   :  { %1124 = vmatpush.msra.mxu1 %v3580_v58  ;;  %998 = vmatpush.msra.mxu3 %v3581_v21  ;;  %v2938_v58 = vld [vmem:[%s3480_s3 + $0x1f0] sm:$0xff]  ;;  %v2943_v21 = vld [vmem:[%s3480_s3 + $0xe8] sm:$0xff] }
  0xdc   :  { %1181 = vmatpush.msrb.mxu2 %v3582_v44  ;;  %1985 = vmatpush.msk.msrb.mxu0 %vm704_vm5, %v1256_v5  ;;  %v2957_v44 = vld [vmem:[%s3480_s3 + $0x168] sm:$0xff]  ;;  %v3117_v19 = vld [vmem:[%s3480_s3 + $0xb0] sm:$0xff] }
  0xdd   :  { %999 = vmatpush.msra.mxu3 %v3583_v61  ;;  %1105 = vmatmul.f32.gmra.mxu0 %v1077_v29  ;;  %v2962_v29 = vld [vmem:[%s3480_s3 + $0x1e8] sm:$0xff]  ;;  %v2974_v61 = vld [vmem:[%s3480_s3 + $0x60] sm:$0xff]  ;;  %v3241_v5 = vld [vmem:[%s3480_s3 + $0x110] sm:$0xff] }
  0xde   :  { %1182 = vmatpush.msrb.mxu2 %v3584_v41  ;;  %1980 = vmatpush.msk.msrb.mxu1 %vm704_vm5, %v1979_v45  ;;  %v2984_v41 = vld [vmem:[%s3480_s3 + $0x1e0] sm:$0xff]  ;;  %v3144_v4 = vld [vmem:[%s3480_s3 + $0x28] sm:$0xff]  ;;  %v3236_v45 = vld [vmem:[%s3480_s3 + $0x10] sm:$0xff]  ;;  %3614 = vst [vmem:[#allocation10_spill] sm:$0xff] %v3241_v5 }
  0xdf   :  { %1000 = vmatpush.msra.mxu3 %v3585_v52  ;;  %1924 = vmatmul.msk.f32.vlgmr.msra.gmra.mxu2 %vm18_vm0, %v986_v34  ;;  %v2996_v52 = vld [vmem:[%s3480_s3 + $0x58] sm:$0xff]  ;;  %v3019_v34 = vld [vmem:[%s3480_s3 + $0xd0] sm:$0xff]  ;;  %3613 = vst [vmem:[#allocation19_spill] sm:$0xff] %v3236_v45 }
  0xe0   :  { %1183 = vmatpush.msrb.mxu2 %v3586_v11  ;;  %1903 = vmatmul.msk.f32.vlgmr.msrb.gmra.mxu3 %vm18_vm0, %v841_v9  ;;  %v3003_v9 = vld [vmem:[%s3480_s3 + $0x158] sm:$0xff] }
  0xe1   :  { %1001 = vmatpush.msra.mxu3 %v3587_v38  ;;  %1294 = vmatpush.msrb.mxu1 %v2921_v28  ;;  %v3008_v11 = vld [vmem:[%s3480_s3 + $0x1d8] sm:$0xff]  ;;  %v3024_v38 = vld [vmem:[%s3480_s3 + $0x50] sm:$0xff] }
  0xe2   :  { %929 = vmatmul.f32.gmra.mxu1 %v899_v59  ;;  %1184 = vmatpush.msrb.mxu2 %v3588_v51  ;;  %v1136_v59 = vld [vmem:[#allocation2 + $0x40] sm:$0x3]  ;;  %v3029_v51 = vld [vmem:[%s3480_s3 + $0x150] sm:$0xff] }
  0xe3   :  { %1002 = vmatpush.msra.mxu3 %v3589_v12  ;;  %v1166_v24 = vrot.slane %v1136_v59, 5  ;;  %1338 = vmatpush.msrb.mxu0 %v2926_v25  ;;  %v3182_v59 = vld [vmem:[%s3480_s3 + $0x1a0] sm:$0xff] }
  0xe4   :  { %1185 = vmatpush.msrb.mxu2 %v3590_v26  ;;  %1295 = vmatpush.msrb.mxu1 %v2943_v21  ;;  %3607 = vst [vmem:[#allocation15_spill] sm:$0xff] %v3182_v59 }
  0xe5   :  { %1003 = vmatpush.msra.mxu3 %v3591_v56  ;;  %v1167_v47 = vsel %vm1159_vm8, %v1161_v62, %v1166_v24  ;;  %v3050_v56 = vld [vmem:[%s3480_s3 + $0x48] sm:$0xff]  ;;  %v3127_v62 = vld [vmem:[%s3480_s3 + $0x130] sm:$0xff]  ;;  %v3189_v24 = vld [vmem:[%s3480_s3 + $0x98] sm:$0xff] }
  0xe6   :  { %1186 = vmatpush.msrb.mxu2 %v3592_v42  ;;  %v3057_v42 = vld [vmem:[%s3480_s3 + $0x148] sm:$0xff]  ;;  %3608 = vst [vmem:[#allocation8_spill] sm:$0xff] %v3189_v24 }
  0xe7   :  { %1004 = vmatpush.msra.mxu3 %v3593_v14  ;;  %1925 = vmatmul.msk.f32.gmra.mxu2 %vm18_vm0, %v985_v1  ;;  %v2967_v1 = vld [vmem:[%s3480_s3 + $0xe0] sm:$0xff] }
  0xe8   :  { %1187 = vmatpush.msrb.mxu2 %v3594_v48  ;;  %1904 = vmatmul.msk.f32.gmra.mxu3 %vm18_vm0, %v840_v27  ;;  %v2948_v27 = vld [vmem:[%s3480_s3 + $0x68] sm:$0xff]  ;;  %v3067_v14 = vld [vmem:[%s3480_s3 + $0xc0] sm:$0xff] }
  0xe9   :  { %1005 = vmatpush.msra.mxu3 %v3595_v16  ;;  %1339 = vmatpush.msrb.mxu0 %v2948_v27  ;;  %v3074_v48 = vld [vmem:[%s3480_s3 + $0x40] sm:$0xff] }
  0xea   :  { %1943 = vmatmul.msk.f32.vlgmr.msra.gmra.mxu1 %vm18_vm0, %v1075_v15  ;;  %1188 = vmatpush.msrb.mxu2 %v3596_v17  ;;  %v3079_v15 = vld [vmem:[%s3480_s3 + $0x140] sm:$0xff]  ;;  %v3091_v17 = vld [vmem:[%s3480_s3 + $0xb8] sm:$0xff] }
  0xeb   :  { %1006 = vmatpush.msra.mxu3 %v3597_v18  ;;  %1296 = vmatpush.msrb.mxu1 %v2967_v1  ;;  %v3084_v16 = vld [vmem:[%s3480_s3 + $0x1c0] sm:$0xff]  ;;  %v3103_v18 = vld [vmem:[%s3480_s3 + $0x138] sm:$0xff] }
  0xec   :  { %1189 = vmatpush.msrb.mxu2 %v3598_v30  ;;  %1340 = vmatpush.msrb.mxu0 %v2974_v61  ;;  %v3122_v30 = vld [vmem:[%s3480_s3 + $0x30] sm:$0xff] }
  0xed   :  { %1007 = vmatpush.msra.mxu3 %v3599_v2  ;;  %1297 = vmatpush.msrb.mxu1 %v2991_v63  ;;  %v3134_v2 = vld [vmem:[%s3480_s3 + $0x1b0] sm:$0xff] }
  0xee   :  { %1190 = vmatpush.msrb.mxu2 %v3600_v23  ;;  %1341 = vmatpush.msrb.mxu0 %v2996_v52  ;;  %v3151_v23 = vld [vmem:[%s3480_s3 + $0x128] sm:$0xff] }
  0xef   :  { %1008 = vmatpush.msra.mxu3 %v3601_v36  ;;  %1298 = vmatpush.msrb.mxu1 %v3019_v34 }
  0xf0   :  { %1191 = vmatpush.msrb.mxu2 %v3602_v49  ;;  %1009 = vmatmul.f32.vlgmr.msra.gmra.mxu3 %v983_v10  ;;  %v3165_v10 = vld [vmem:[%s3480_s3 + $0xa0] sm:$0xff] }
  0xf1   :  { %1192 = vmatmul.f32.vlgmr.msrb.gmra.mxu2 %v1162_v31  ;;  %1214 = vmatpush.msrb.mxu3 %v2718_v8  ;;  %v1168_v8 = vrot.slane %v1137_v53, 5  ;;  %3604 = vst [vmem:[#allocation13_spill] sm:$0xff] %v3165_v10  ;;  %v3170_v49 = vld [vmem:[%s3480_s3 + $0x20] sm:$0xff] }
  0xf2   :  { %1944 = vmatmul.msk.f32.gmra.mxu1 %vm18_vm0, %v1079_v20  ;;  %2027 = vmatpush.msk.msra.mxu2 %vm704_vm5, %v2026_v39  ;;  %3605 = vst [vmem:[#allocation7_spill] sm:$0xff] %v3170_v49  ;;  %v3177_v20 = vld [vmem:[%s3480_s3 + $0x120] sm:$0xff]  ;;  %v3249_v39 = vld [vmem:[%s3480_s3 + $0x190] sm:$0xff] }
  0xf3   :  { %v1169_v6 = vsel %vm1159_vm8, %v1164_v55, %v1168_v8  ;;  %2006 = vmatpush.msk.msra.mxu3 %vm704_vm5, %v2005_v3  ;;  %1342 = vmatpush.msrb.mxu0 %v3024_v38  ;;  %3606 = vst [vmem:[#allocation5_spill] sm:$0xff] %v3177_v20  ;;  %v3206_v55 = vld [vmem:[%s3480_s3 + $0x198] sm:$0xff] }
  0xf4   :  { %1472 = vmatpush.msra.mxu2 %v2938_v58  ;;  %1299 = vmatpush.msrb.mxu1 %v3045_v13  ;;  %3611 = vst [vmem:[#allocation9_spill] sm:$0xff] %v3206_v55 }
  0xf5   :  { %1403 = vmatpush.msra.mxu3 %v2931_v37  ;;  %1343 = vmatpush.msrb.mxu0 %v3050_v56  ;;  %3615 = vst [vmem:[#allocation21_spill] sm:$0xff] %v3249_v39 }
  0xf6   :  { %1473 = vmatpush.msra.mxu2 %v2962_v29  ;;  %1300 = vmatpush.msrb.mxu1 %v3067_v14 }
  0xf7   :  { %1404 = vmatpush.msra.mxu3 %v2957_v44  ;;  %1344 = vmatpush.msrb.mxu0 %v3074_v48 }
  0xf8   :  { %1012 = vmatmul.f32.gmra.mxu3 %v982_v57  ;;  %1474 = vmatpush.msra.mxu2 %v2984_v41  ;;  %v3108_v57 = vld [vmem:[%s3480_s3 + $0x1b8] sm:$0xff] }
  0xf9   :  { %1195 = vmatmul.f32.gmra.mxu2 %v1167_v47  ;;  %1405 = vmatpush.msra.mxu3 %v2979_v32  ;;  %v3194_v47 = vld [vmem:[%s3480_s3 + $0x18] sm:$0xff] }
  0xfa   :  { %1475 = vmatpush.msra.mxu2 %v3008_v11  ;;  %1301 = vmatpush.msrb.mxu1 %v3091_v17  ;;  %3609 = vst [vmem:[#allocation6_spill] sm:$0xff] %v3194_v47 }
  0xfb   :  { %1406 = vmatpush.msra.mxu3 %v3003_v9  ;;  %1345 = vmatpush.msrb.mxu0 %v3096_v43 }
  0xfc   :  { %1476 = vmatpush.msra.mxu2 %v3040_v40  ;;  %1302 = vmatpush.msrb.mxu1 %v3117_v19 }
  0xfd   :  { %1407 = vmatpush.msra.mxu3 %v3029_v51  ;;  %1346 = vmatpush.msrb.mxu0 %v3122_v30 }
  0xfe   :  { %1477 = vmatpush.msra.mxu2 %v3062_v50  ;;  %1303 = vmatpush.msrb.mxu1 %v3139_v22 }
  0xff   :  { %1408 = vmatpush.msra.mxu3 %v3057_v42  ;;  %1347 = vmatpush.msrb.mxu0 %v3144_v4 }
 0x100   :  { %1962 = vmatmul.msk.f32.vlgmr.msrb.gmra.mxu3 %vm18_vm0, %v1165_v35  ;;  %1478 = vmatpush.msra.mxu2 %v3084_v16 }
 0x101   :  { %1409 = vmatpush.msra.mxu3 %v3079_v15  ;;  %1304 = vmatpush.msrb.mxu1 %v3165_v10 }
 0x102   :  { %1479 = vmatpush.msra.mxu2 %v3108_v57  ;;  %1348 = vmatpush.msrb.mxu0 %v3170_v49 }
 0x103   :  { %1410 = vmatpush.msra.mxu3 %v3103_v18  ;;  %1305 = vmatpush.msrb.mxu1 %v3189_v24  ;;  %v3293_v24 = vld [vmem:[%s3480_s3 + $0x180] sm:$0xff] }
 0x104   :  { %1480 = vmatpush.msra.mxu2 %v3134_v2  ;;  %1349 = vmatpush.msrb.mxu0 %v3194_v47  ;;  %3621 = vst [vmem:[#allocation28_spill] sm:$0xff] %v3293_v24 }
 0x105   :  { %1411 = vmatpush.msra.mxu3 %v3127_v62 }
 0x106   :  { %1481 = vmatpush.msra.mxu2 %v3156_v7  ;;  %1350 = vmatpush.msrb.mxu0 %v3236_v45  ;;  %v3271_v45 = vld [vmem:[%s3480_s3 + $0x188] sm:$0xff] }
 0x107   :  { %1412 = vmatpush.msra.mxu3 %v3151_v23  ;;  %3619 = vst [vmem:[#allocation26_spill] sm:$0xff] %v3271_v45 }
 0x108   :  { %1963 = vmatmul.msk.f32.gmra.mxu3 %vm18_vm0, %v1169_v6  ;;  %1482 = vmatpush.msra.mxu2 %v3182_v59  ;;  %v3231_v6 = vld [vmem:[%s3480_s3 + $0x90] sm:$0xff]  ;;  %vm781_vm0 = vcmask 1013766  }
 0x109   :  { %1413 = vmatpush.msra.mxu3 %v3177_v20  ;;  %3612 = vst [vmem:[#allocation24_spill] sm:$0xff] %v3231_v6  ;;  %1306 = vmatpush.msrb.mxu1 %v3231_v6  ;;  %v3276_v6 = vld [vmem:[%s3480_s3 + $0x80] sm:$0xff] }
 0x10a   :  { %1483 = vmatpush.msra.mxu2 %v3206_v55  ;;  %v3259_v55 = vld [vmem:[%s3480_s3 + $0x8] sm:$0xff] }
 0x10b   :  { %1414 = vmatpush.msra.mxu3 %v3201_v0  ;;  %3617 = vst [vmem:[#allocation23_spill] sm:$0xff] %v3259_v55  ;;  %1307 = vmatpush.msrb.mxu1 %v3254_v46 }
 0x10c   :  { %1484 = vmatpush.msra.mxu2 %v3249_v39  ;;  %1351 = vmatpush.msrb.mxu0 %v3259_v55  ;;  %v3283_v39 = vld [vmem:[%s3480_s3] sm:$0xff] }
 0x10d   :  { %1415 = vmatpush.msra.mxu3 %v3241_v5  ;;  %3620 = vst [vmem:[#allocation14_spill] sm:$0xff] %v3283_v39  ;;  %v3288_v5 = vld [vmem:[%s3480_s3 + $0x100] sm:$0xff]  ;;  %1308 = vmatpush.msrb.mxu1 %v3276_v6 }
 0x10e   :  { %1485 = vmatpush.msra.mxu2 %v3271_v45  ;;  %1352 = vmatpush.msrb.mxu0 %v3283_v39  ;;  %v2073_v39 = vld [vmem:[%s3480_s3 + $0x178] sm:$0xf] }
 0x110   :  { %1486 = vmatpush.msra.mxu2 %v3293_v24  ;;  %v2047_v24 = vld [vmem:[%s3480_s3 + $0xf8] sm:$0xf] }
 0x111   :  { %v2950_v60 = vpop.f32.mrf.mxu1  ;;  %v471_v35 = vpop.f32.mrf.mxu0  ;;  %2048 = vmatpush.msk.msra.mxu1 %vm704_vm5, %v2047_v24 }
 0x113   :  { %1570 = vmatpush.msra.mxu1 %v2921_v28 }
 0x115   :  { %1571 = vmatpush.msra.mxu1 %v2943_v21 }
 0x117   :  { %1572 = vmatpush.msra.mxu1 %v2967_v1 }
 0x119   :  { %1573 = vmatpush.msra.mxu1 %v2991_v63 }
 0x11b   :  { %1574 = vmatpush.msra.mxu1 %v3019_v34 }
 0x11d   :  { %1575 = vmatpush.msra.mxu1 %v3045_v13  ;;  %v3623_v13 = vld [vmem:[#allocation5_spill] sm:$0xff] }
 0x11f   :  { %1576 = vmatpush.msra.mxu1 %v3067_v14 }
 0x121   :  { %1577 = vmatpush.msra.mxu1 %v3091_v17 }
 0x123   :  { %1578 = vmatpush.msra.mxu1 %v3117_v19 }
 0x124   :  { %v3031_v12 = vpop.f32.mrf.mxu1 }
 0x125   :  { %1579 = vmatpush.msra.mxu1 %v3139_v22  ;;  %v3634_v22 = vld [vmem:[#allocation19_spill] sm:$0xff] }
 0x12d   :  { %v579_v31 = vpop.f32.mrf.mxu1 }
 0x12e   :  { %v3033_v26 = vpop.f32.mrf.mxu3  ;;  %v419_v54 = vpop.f32.mrf.mxu2 }
 0x12f   :  { %v443_v3 = vadd.f32 %v3033_v26, %v419_v54  ;;  %v474_v26 = vpop.f32.mrf.mxu0  ;;  %v3266_v54 = vld [vmem:[%s3480_s3 + $0x108] sm:$0xff] }
 0x130   :  { %3618 = vst [vmem:[#allocation12_spill] sm:$0xff] %v3266_v54  ;;  %1416 = vmatpush.msra.mxu3 %v3266_v54 }
 0x131   :  { %v472_v55 = vadd.f32 %v471_v35, %v443_v3 }
 0x132   :  { %1417 = vmatpush.msra.mxu3 %v3288_v5 }
 0x133   :  { %v495_v49 = vadd.f32 %v2950_v60, %v472_v55  ;;  %v1533_v60 = vld [vmem:[%s3480_s3 + $0x78] sm:$0xf]  ;;  %v3638_v55 = vld [vmem:[#allocation23_spill] sm:$0xff] }
 0x134   :  { %2074 = vmatpush.msk.msrb.mxu3 %vm704_vm5, %v2073_v39  ;;  %2053 = vmatpush.msk.msra.mxu0 %vm704_vm5, %v1533_v60 }
 0x135   :  { %v582_v8 = vpop.f32.mrf.mxu1 }
 0x136   :  { %v422_v33 = vpop.f32.mrf.mxu2  ;;  %1678 = vmatpush.msrb.mxu3 %v2931_v37  ;;  %1614 = vmatpush.msra.mxu0 %v2926_v25 }
 0x137   :  { %v3158_v36 = vpop.f32.mrf.mxu3  ;;  %v738_v54 = vpop.f32.mrf.mxu0 }
 0x138   :  { %v446_v10 = vadd.f32 %v3158_v36, %v422_v33  ;;  %1679 = vmatpush.msrb.mxu3 %v2957_v44  ;;  %1615 = vmatpush.msra.mxu0 %v2948_v27  ;;  %v3639_v33 = vld [vmem:[#allocation26_spill] sm:$0xff] }
 0x13a   :  { %v475_v35 = vadd.f32 %v474_v26, %v446_v10  ;;  %v2094_v10 = vld [vmem:[%s3480_s3 + $0x1f8] sm:$0xf]  ;;  %1680 = vmatpush.msrb.mxu3 %v2979_v32  ;;  %1616 = vmatpush.msra.mxu0 %v2974_v61  ;;  %v3640_v26 = vld [vmem:[#allocation14_spill] sm:$0xff] }
 0x13b   :  { %2095 = vmatpush.msk.msrb.mxu2 %vm704_vm5, %v2094_v10 }
 0x13c   :  { %1681 = vmatpush.msrb.mxu3 %v3003_v9  ;;  %1617 = vmatpush.msra.mxu0 %v2996_v52 }
 0x13d   :  { %1746 = vmatpush.msrb.mxu2 %v2938_v58 }
 0x13e   :  { %1682 = vmatpush.msrb.mxu3 %v3029_v51  ;;  %1618 = vmatpush.msra.mxu0 %v3024_v38  ;;  %v3622_v51 = vld [vmem:[#allocation4_spill] sm:$0xff] }
 0x13f   :  { %v556_v53 = vpop.f32.mrf.mxu3  ;;  %v643_v59 = vpop.f32.mrf.mxu1  ;;  %1747 = vmatpush.msrb.mxu2 %v2962_v29 }
 0x140   :  { %v666_v47 = vpop.f32.mrf.mxu2  ;;  %v580_v0 = vadd.f32 %v579_v31, %v556_v53  ;;  %v741_v28 = vpop.f32.mrf.mxu0  ;;  %1683 = vmatpush.msrb.mxu3 %v3057_v42  ;;  %1619 = vmatpush.msra.mxu0 %v3050_v56  ;;  %v3624_v56 = vld [vmem:[#allocation13_spill] sm:$0xff]  ;;  %v3625_v42 = vld [vmem:[#allocation7_spill] sm:$0xff] }
 0x141   :  { %v667_v7 = vadd.f32 %v666_v47, %v643_v59  ;;  %1748 = vmatpush.msrb.mxu2 %v2984_v41  ;;  %1580 = vmatpush.msra.mxu1 %v3624_v56  ;;  %v3636_v47 = vld [vmem:[#allocation12_spill] sm:$0xff] }
 0x142   :  { %v585_v20 = vadd.f32 %v580_v0, %v495_v49  ;;  %1684 = vmatpush.msrb.mxu3 %v3079_v15  ;;  %1620 = vmatpush.msra.mxu0 %v3074_v48  ;;  %v3627_v48 = vld [vmem:[#allocation17_spill] sm:$0xff]  ;;  %v3628_v15 = vld [vmem:[#allocation8_spill] sm:$0xff]  ;;  %v3637_v0 = vld [vmem:[#allocation11_spill] sm:$0xff] }
 0x143   :  { %1749 = vmatpush.msrb.mxu2 %v3008_v11  ;;  %1581 = vmatpush.msra.mxu1 %v3628_v15 }
 0x144   :  { %v672_v31 = vadd.f32 %v667_v7, %v585_v20  ;;  %v498_v7 = vadd.f32 %v3031_v12, %v475_v35  ;;  %1685 = vmatpush.msrb.mxu3 %v3103_v18  ;;  %1621 = vmatpush.msra.mxu0 %v3096_v43  ;;  %v3629_v43 = vld [vmem:[#allocation6_spill] sm:$0xff]  ;;  %v3630_v18 = vld [vmem:[#allocation9_spill] sm:$0xff] }
 0x145   :  { %1750 = vmatpush.msrb.mxu2 %v3040_v40 }
 0x146   :  { %1686 = vmatpush.msrb.mxu3 %v3127_v62  ;;  %1622 = vmatpush.msra.mxu0 %v3122_v30  ;;  %v3631_v30 = vmov 0.0   ;;  %v3632_v62 = vld [vmem:[#allocation10_spill] sm:$0xff] }
 0x147   :  { %1751 = vmatpush.msrb.mxu2 %v3062_v50  ;;  %v3626_v50 = vld [vmem:[#allocation15_spill] sm:$0xff]  ;;  %38 = vst.msk [vmem:[#allocation3 + $0x38] sm:$0x3f] %vm37_vm2, %v3631_v30 }
 0x148   :  { %v559_v46 = vpop.f32.mrf.mxu3  ;;  %v646_v20 = vpop.f32.mrf.mxu1  ;;  %1687 = vmatpush.msrb.mxu3 %v3151_v23  ;;  %1623 = vmatpush.msra.mxu0 %v3144_v4  ;;  %v3635_v4 = vld [vmem:[#allocation21_spill] sm:$0xff] }
 0x149   :  { %v669_v45 = vpop.f32.mrf.mxu2  ;;  %v583_v49 = vadd.f32 %v582_v8, %v559_v46  ;;  %1752 = vmatpush.msrb.mxu2 %v3084_v16  ;;  %v950_v12 = vpop.f32.mrf.mxu0 }
 0x14a   :  { %v670_v25 = vadd.f32 %v669_v45, %v646_v20  ;;  %1688 = vmatpush.msrb.mxu3 %v3623_v13  ;;  %1624 = vmatpush.msra.mxu0 %v3625_v42 }
 0x14b   :  { %v586_v46 = vadd.f32 %v583_v49, %v498_v7  ;;  %1753 = vmatpush.msrb.mxu2 %v3108_v57 }
 0x14c   :  { %1689 = vmatpush.msrb.mxu3 %v3627_v48  ;;  %1625 = vmatpush.msra.mxu0 %v3629_v43 }
 0x14d   :  { %v673_v21 = vadd.f32 %v670_v25, %v586_v46  ;;  %1754 = vmatpush.msrb.mxu2 %v3134_v2  ;;  %v3633_v2 = vld [vmem:[#allocation24_spill] sm:$0xff] }
 0x14e   :  { %1690 = vmatpush.msrb.mxu3 %v3632_v62  ;;  %1582 = vmatpush.msra.mxu1 %v3633_v2 }
 0x14f   :  { %1755 = vmatpush.msrb.mxu2 %v3622_v51  ;;  %1626 = vmatpush.msra.mxu0 %v3634_v22 }
 0x150   :  { %1691 = vmatpush.msrb.mxu3 %v3636_v47  ;;  %1583 = vmatpush.msra.mxu1 %v3637_v0 }
 0x151   :  { %v761_v3 = vpop.f32.mrf.mxu3  ;;  %1756 = vmatpush.msrb.mxu2 %v3626_v50  ;;  %1627 = vmatpush.msra.mxu0 %v3638_v55  ;;  %v953_v53 = vpop.f32.mrf.mxu0 }
 0x152   :  { %v762_v36 = vadd.f32 %v761_v3, %v738_v54  ;;  %v3336_v37 = vpop.f32.mrf.mxu2  ;;  %1692 = vmatpush.msrb.mxu3 %v3288_v5  ;;  %1584 = vmatpush.msra.mxu1 %v3276_v6  ;;  %v3641_v54 = vld [vmem:[#allocation28_spill] sm:$0xff] }
 0x153   :  { %1757 = vmatpush.msrb.mxu2 %v3630_v18  ;;  %1628 = vmatpush.msra.mxu0 %v3640_v26 }
 0x154   :  { %v767_v59 = vadd.f32 %v762_v36, %v672_v31 }
 0x155   :  { %1758 = vmatpush.msrb.mxu2 %v3635_v4 }
 0x156   :  { %770 = vst.msk [vmem:[#allocation3 + $0x3] sm:$0x1] %vm769_vm10, %v767_v59 }
 0x157   :  { %772 = vst.msk [vmem:[#allocation3 + $0x4] sm:$0x2] %vm771_vm11, %v767_v59  ;;  %v927_v38 = vpop.f32.mrf.mxu1  ;;  %1759 = vmatpush.msrb.mxu2 %v3639_v33 }
 0x158   :  { %774 = vst.msk [vmem:[#allocation3 + $0x5] sm:$0x4] %vm773_vm12, %v767_v59 }
 0x159   :  { %776 = vst.msk [vmem:[#allocation3 + $0x6] sm:$0x8] %vm775_vm13, %v767_v59  ;;  %1760 = vmatpush.msrb.mxu2 %v3641_v54 }
 0x15a   :  { %778 = vst.msk [vmem:[#allocation3 + $0x7] sm:$0x10] %vm777_vm14, %v767_v59  ;;  %v3367_v63 = vpop.f32.mrf.mxu2 }
 0x15b   :  { %v764_v58 = vpop.f32.mrf.mxu3  ;;  %780 = vst.msk [vmem:[#allocation3 + $0x8] sm:$0x20] %vm779_vm15, %v767_v59 }
 0x15c   :  { %v765_v27 = vadd.f32 %v764_v58, %v741_v28  ;;  %782 = vst.msk [vmem:[#allocation3 + $0x9] sm:$0x40] %vm781_vm0, %v767_v59 }
 0x15d   :  { %784 = vst.msk [vmem:[#allocation3 + $0xa] sm:$0x80] %vm783_vm1, %v767_v59  ;;  %v1103_v59 = vpop.f32.mrf.mxu0 }
 0x15e   :  { %v768_v44 = vadd.f32 %v765_v27, %v673_v21 }
 0x15f   :  { %v1257_v29 = vld [vmem:[#allocation3 + $0x1] sm:$0xff]  ;;  %v930_v23 = vpop.f32.mrf.mxu1 }
 0x160   :  { %785 = vst.msk [vmem:[#allocation3 + $0x13] sm:$0x1] %vm769_vm10, %v768_v44  ;;  %v1237_v1 = vld [vmem:[#allocation3] sm:$0xff]  ;;  %1981 = vmatmul.msk.f32.vlgmr.msrb.gmra.mxu1 %vm29_vm9, %v1257_v29 }
 0x161   :  { %786 = vst.msk [vmem:[#allocation3 + $0x14] sm:$0x2] %vm771_vm11, %v768_v44  ;;  %1986 = vmatmul.msk.f32.vlgmr.msrb.gmra.mxu0 %vm29_vm9, %v1237_v1  ;;  %v1366_v61 = vld [vmem:[#allocation3 + $0x2] sm:$0xff] }
 0x162   :  { %v1435_v32 = vld [vmem:[#allocation3 + $0x3] sm:$0xff]  ;;  %787 = vst.msk [vmem:[#allocation3 + $0x15] sm:$0x4] %vm773_vm12, %v768_v44  ;;  %2007 = vmatmul.msk.f32.vlgmr.msra.gmra.mxu3 %vm29_vm9, %v1366_v61  ;;  %v1033_v14 = vpop.f32.mrf.mxu2 }
 0x163   :  { %2028 = vmatmul.msk.f32.vlgmr.msra.gmra.mxu2 %vm29_vm9, %v1435_v32  ;;  %788 = vst.msk [vmem:[#allocation3 + $0x16] sm:$0x8] %vm775_vm13, %v768_v44  ;;  %v888_v41 = vpop.f32.mrf.mxu3  ;;  %v1258_v52 = vld [vmem:[#allocation3 + $0x9] sm:$0xff] }
 0x164   :  { %789 = vst.msk [vmem:[#allocation3 + $0x17] sm:$0x10] %vm777_vm14, %v768_v44  ;;  %v1238_v9 = vld [vmem:[#allocation3 + $0x8] sm:$0xff]  ;;  %v889_v8 = vadd.f32 %v888_v41, %v3336_v37 }
 0x165   :  { %v1367_v11 = vld [vmem:[#allocation3 + $0xa] sm:$0xff]  ;;  %v1106_v61 = vpop.f32.mrf.mxu0 }
 0x166   :  { %v1436_v34 = vld [vmem:[#allocation3 + $0xb] sm:$0xff]  ;;  %v928_v6 = vadd.f32 %v927_v38, %v889_v8 }
 0x167   :  { %v1126_v36 = vpop.f32.mrf.mxu1 }
 0x168   :  { %1982 = vmatmul.msk.f32.gmra.mxu1 %vm29_vm9, %v1258_v52  ;;  %v951_v49 = vadd.f32 %v950_v12, %v928_v6  ;;  %v1127_v46 = vadd.f32 %v1126_v36, %v1103_v59 }
 0x169   :  { %1987 = vmatmul.msk.f32.gmra.mxu0 %vm29_vm9, %v1238_v9  ;;  %v1259_v16 = vld [vmem:[#allocation3 + $0x11] sm:$0xff] }
 0x16a   :  { %2008 = vmatmul.msk.f32.gmra.mxu3 %vm29_vm9, %v1367_v11  ;;  %v1239_v17 = vld [vmem:[#allocation3 + $0x10] sm:$0xff]  ;;  %v1036_v35 = vpop.f32.mrf.mxu2 }
 0x16b   :  { %2029 = vmatmul.msk.f32.gmra.mxu2 %vm29_vm9, %v1436_v34  ;;  %v891_v40 = vpop.f32.mrf.mxu3  ;;  %v1368_v57 = vld [vmem:[#allocation3 + $0x12] sm:$0xff]  ;;  %v1369_v3 = vld [vmem:[#allocation3 + $0x1a] sm:$0xf] }
 0x16c   :  { %v1437_v19 = vld [vmem:[#allocation3 + $0x13] sm:$0xff]  ;;  %v1438_v60 = vld [vmem:[#allocation3 + $0x1b] sm:$0xf]  ;;  %v892_v10 = vadd.f32 %v891_v40, %v3367_v63 }
 0x16d   :  { %v1260_v45 = vld [vmem:[#allocation3 + $0x19] sm:$0xf] }
 0x16e   :  { %v1240_v39 = vld [vmem:[#allocation3 + $0x18] sm:$0xf]  ;;  %v931_v28 = vadd.f32 %v930_v23, %v892_v10 }
 0x16f   :  { %v1129_v29 = vpop.f32.mrf.mxu1 }
 0x170   :  { %1983 = vmatmul.msk.f32.gmra.mxu1 %vm29_vm9, %v1259_v16  ;;  %v954_v27 = vadd.f32 %v953_v53, %v931_v28  ;;  %v1130_v32 = vadd.f32 %v1129_v29, %v1106_v61 }
 0x171   :  { %1988 = vmatmul.msk.f32.gmra.mxu0 %vm29_vm9, %v1239_v17 }
 0x172   :  { %2009 = vmatmul.msk.f32.gmra.mxu3 %vm29_vm9, %v1368_v57 }
 0x173   :  { %2030 = vmatmul.msk.f32.gmra.mxu2 %vm29_vm9, %v1437_v19  ;;  %v1010_v24 = vpop.f32.mrf.mxu3 }
 0x174   :  { %v1034_v31 = vadd.f32 %v1033_v14, %v1010_v24  ;;  %v1193_v20 = vpop.f32.mrf.mxu2 }
 0x176   :  { %v1039_v7 = vadd.f32 %v1034_v31, %v951_v49 }
 0x178   :  { %1984 = vmatmul.msk.f32.gmra.mxu1 %vm29_vm9, %v1260_v45  ;;  %v1132_v58 = vadd.f32 %v1127_v46, %v1039_v7 }
 0x179   :  { %1989 = vmatmul.msk.f32.gmra.mxu0 %vm29_vm9, %v1240_v39 }
 0x17a   :  { %2010 = vmatmul.msk.f32.gmra.mxu3 %vm29_vm9, %v1369_v3 }
 0x17b   :  { %2031 = vmatmul.msk.f32.gmra.mxu2 %vm29_vm9, %v1438_v60  ;;  %v1013_v5 = vpop.f32.mrf.mxu3 }
 0x17c   :  { %v1037_v37 = vadd.f32 %v1036_v35, %v1013_v5  ;;  %v1196_v41 = vpop.f32.mrf.mxu2 }
 0x17e   :  { %v1040_v1 = vadd.f32 %v1037_v37, %v954_v27 }
 0x180   :  { %v1133_v52 = vadd.f32 %v1130_v32, %v1040_v1 }
 0x183   :  { %v1216_v25 = vpop.f32.mrf.mxu3 }
 0x184   :  { %v1217_v21 = vadd.f32 %v1216_v25, %v1193_v20 }
 0x186   :  { %v1222_v44 = vadd.f32 %v1217_v21, %v1132_v58 }
 0x188   :  { %1224 = vst.msk [vmem:[#allocation3 + $0x22] sm:$0x1] %vm769_vm10, %v1222_v44 }
 0x189   :  { %1225 = vst.msk [vmem:[#allocation3 + $0x23] sm:$0x2] %vm771_vm11, %v1222_v44 }
 0x18a   :  { %1226 = vst.msk [vmem:[#allocation3 + $0x24] sm:$0x4] %vm773_vm12, %v1222_v44 }
 0x18b   :  { %1227 = vst.msk [vmem:[#allocation3 + $0x25] sm:$0x8] %vm775_vm13, %v1222_v44  ;;  %v1219_v63 = vpop.f32.mrf.mxu3 }
 0x18c   :  { %1228 = vst.msk [vmem:[#allocation3 + $0x26] sm:$0x10] %vm777_vm14, %v1222_v44  ;;  %v1220_v9 = vadd.f32 %v1219_v63, %v1196_v41 }
 0x18d   :  { %1229 = vst.msk [vmem:[#allocation3 + $0x27] sm:$0x20] %vm779_vm15, %v1222_v44 }
 0x18e   :  { %1230 = vst.msk [vmem:[#allocation3 + $0x28] sm:$0x40] %vm781_vm0, %v1222_v44  ;;  %v1223_v11 = vadd.f32 %v1220_v9, %v1133_v52 }
 0x18f   :  { %1231 = vst.msk [vmem:[#allocation3 + $0x29] sm:$0x80] %vm783_vm1, %v1222_v44 }
 0x190   :  { %1232 = vst.msk [vmem:[#allocation3 + $0x32] sm:$0x1] %vm769_vm10, %v1223_v11 }
 0x191   :  { %1233 = vst.msk [vmem:[#allocation3 + $0x33] sm:$0x2] %vm771_vm11, %v1223_v11  ;;  %v1534_v34 = vld [vmem:[#allocation3 + $0x20] sm:$0xff] }
 0x192   :  { %v1514_v38 = vld [vmem:[#allocation3 + $0x1f] sm:$0xff]  ;;  %1234 = vst.msk [vmem:[#allocation3 + $0x34] sm:$0x4] %vm773_vm12, %v1223_v11  ;;  %2049 = vmatmul.msk.f32.vlgmr.msra.gmra.mxu1 %vm29_vm9, %v1534_v34 }
 0x193   :  { %2054 = vmatmul.msk.f32.vlgmr.msra.gmra.mxu0 %vm29_vm9, %v1514_v38  ;;  %v1642_v51 = vld [vmem:[#allocation3 + $0x21] sm:$0xff]  ;;  %1235 = vst.msk [vmem:[#allocation3 + $0x35] sm:$0x8] %vm775_vm13, %v1223_v11 }
 0x194   :  { %v1710_v12 = vld [vmem:[#allocation3 + $0x22] sm:$0xff]  ;;  %2075 = vmatmul.msk.f32.vlgmr.msrb.gmra.mxu3 %vm29_vm9, %v1642_v51  ;;  %1236 = vst.msk [vmem:[#allocation3 + $0x36] sm:$0x10] %vm777_vm14, %v1223_v11 }
 0x195   :  { %2096 = vmatmul.msk.f32.vlgmr.msrb.gmra.mxu2 %vm29_vm9, %v1710_v12  ;;  %v1535_v40 = vld [vmem:[#allocation3 + $0x28] sm:$0xff] }
 0x196   :  { %v1515_v13 = vld [vmem:[#allocation3 + $0x27] sm:$0xff] }
 0x197   :  { %v1643_v56 = vld [vmem:[#allocation3 + $0x29] sm:$0xff] }
 0x198   :  { %v1711_v42 = vld [vmem:[#allocation3 + $0x2a] sm:$0xff] }
 0x199   :  { %v1536_v50 = vld [vmem:[#allocation3 + $0x30] sm:$0xff] }
 0x19a   :  { %2050 = vmatmul.msk.f32.gmra.mxu1 %vm29_vm9, %v1535_v40  ;;  %v1516_v14 = vld [vmem:[#allocation3 + $0x2f] sm:$0xff] }
 0x19b   :  { %2055 = vmatmul.msk.f32.gmra.mxu0 %vm29_vm9, %v1515_v13  ;;  %v1644_v48 = vld [vmem:[#allocation3 + $0x31] sm:$0xff]  ;;  %v1645_v43 = vld [vmem:[#allocation3 + $0x39] sm:$0xf] }
 0x19c   :  { %2076 = vmatmul.msk.f32.gmra.mxu3 %vm29_vm9, %v1643_v56  ;;  %v1712_v15 = vld [vmem:[#allocation3 + $0x32] sm:$0xff]  ;;  %v1713_v18 = vld [vmem:[#allocation3 + $0x3a] sm:$0xf] }
 0x19d   :  { %2097 = vmatmul.msk.f32.gmra.mxu2 %vm29_vm9, %v1711_v42  ;;  %v1537_v16 = vld [vmem:[#allocation3 + $0x38] sm:$0xf] }
 0x19e   :  { %v1517_v17 = vld [vmem:[#allocation3 + $0x37] sm:$0xf] }
 0x1a2   :  { %2051 = vmatmul.msk.f32.gmra.mxu1 %vm29_vm9, %v1536_v50 }
 0x1a3   :  { %2056 = vmatmul.msk.f32.gmra.mxu0 %vm29_vm9, %v1516_v14 }
 0x1a4   :  { %2077 = vmatmul.msk.f32.gmra.mxu3 %vm29_vm9, %v1644_v48 }
 0x1a5   :  { %2098 = vmatmul.msk.f32.gmra.mxu2 %vm29_vm9, %v1712_v15 }
 0x1aa   :  { %2052 = vmatmul.msk.f32.gmra.mxu1 %vm29_vm9, %v1537_v16 }
 0x1ab   :  { %2057 = vmatmul.msk.f32.gmra.mxu0 %vm29_vm9, %v1517_v17 }
 0x1ac   :  { %2078 = vmatmul.msk.f32.gmra.mxu3 %vm29_vm9, %v1645_v43 }
 0x1ad   :  { %2099 = vmatmul.msk.f32.gmra.mxu2 %vm29_vm9, %v1713_v18 }
 0x1dd   :  { %v1310_v57 = vpop.f32.mrf.mxu1 }
 0x1de   :  { %v1354_v19 = vpop.f32.mrf.mxu0 }
 0x1df   :  { %v1355_v30 = vadd.f32 %v1354_v19, %v1310_v57 }
 0x1e5   :  { %v1419_v62 = vpop.f32.mrf.mxu3  ;;  %v1313_v4 = vpop.f32.mrf.mxu1 }
 0x1e6   :  { %v1488_v2 = vpop.f32.mrf.mxu2  ;;  %v1431_v22 = vadd.f32 %v1419_v62, %v1355_v30  ;;  %v1357_v23 = vpop.f32.mrf.mxu0 }
 0x1e7   :  { %v1358_v47 = vadd.f32 %v1357_v23, %v1313_v4 }
 0x1e8   :  { %v1500_v24 = vadd.f32 %v1488_v2, %v1431_v22 }
 0x1ea   :  { %2101 = vtanh.f32 %v1500_v24 }
 0x1ed   :  { %v1422_v0 = vpop.f32.mrf.mxu3  ;;  %v1316_v53 = vpop.f32.mrf.mxu1 }
 0x1ee   :  { %v1491_v55 = vpop.f32.mrf.mxu2  ;;  %v1432_v33 = vadd.f32 %v1422_v0, %v1358_v47  ;;  %v1360_v8 = vpop.f32.mrf.mxu0 }
 0x1ef   :  { %v1361_v26 = vadd.f32 %v1360_v8, %v1316_v53 }
 0x1f0   :  { %v2102_v45 = vpop.eup %2101  ;;  %v1501_v39 = vadd.f32 %v1491_v55, %v1432_v33 }
 0x1f1   :  { %1509 = vst.msk [vmem:[%s3481_s4] sm:$0xff] %vm1508_vm3, %v2102_v45 }
 0x1f2   :  { %2103 = vtanh.f32 %v1501_v39 }
 0x1f5   :  { %v1425_v54 = vpop.f32.mrf.mxu3  ;;  %v1319_v5 = vpop.f32.mrf.mxu1 }
 0x1f6   :  { %v1494_v35 = vpop.f32.mrf.mxu2  ;;  %v1433_v3 = vadd.f32 %v1425_v54, %v1361_v26  ;;  %v1363_v31 = vpop.f32.mrf.mxu0 }
 0x1f7   :  { %v1364_v36 = vadd.f32 %v1363_v31, %v1319_v5 }
 0x1f8   :  { %v2104_v60 = vpop.eup %2103  ;;  %v1502_v6 = vadd.f32 %v1494_v35, %v1433_v3 }
 0x1f9   :  { %1510 = vst.msk [vmem:[%s3481_s4 + $0x8] sm:$0xff] %vm1508_vm3, %v2104_v60 }
 0x1fa   :  { %2105 = vtanh.f32 %v1502_v6 }
 0x1fd   :  { %v1428_v10 = vpop.f32.mrf.mxu3 }
 0x1fe   :  { %v1434_v49 = vadd.f32 %v1428_v10, %v1364_v36  ;;  %v1497_v59 = vpop.f32.mrf.mxu2 }
 0x200   :  { %v2106_v7 = vpop.eup %2105  ;;  %v1503_v20 = vadd.f32 %v1497_v59, %v1434_v49 }
 0x201   :  { %1511 = vst.msk [vmem:[%s3481_s4 + $0x10] sm:$0xff] %vm1508_vm3, %v2106_v7 }
 0x202   :  { %2107 = vtanh.f32 %v1503_v20 }
 0x208   :  { %v2108_v46 = vpop.eup %2107 }
 0x209   :  { %1513 = vst.msk [vmem:[%s3481_s4 + $0x18] sm:$0xf] %vm1512_vm4, %v2108_v46 }
 0x20f   :  { %v1586_v28 = vpop.f32.mrf.mxu1 }
 0x210   :  { %v1630_v25 = vpop.f32.mrf.mxu0 }
 0x211   :  { %v1631_v37 = vadd.f32 %v1630_v25, %v1586_v28 }
 0x217   :  { %v1694_v58 = vpop.f32.mrf.mxu3  ;;  %v1589_v44 = vpop.f32.mrf.mxu1 }
 0x218   :  { %v1762_v21 = vpop.f32.mrf.mxu2  ;;  %v1706_v27 = vadd.f32 %v1694_v58, %v1631_v37  ;;  %v1633_v29 = vpop.f32.mrf.mxu0 }
 0x219   :  { %v1634_v61 = vadd.f32 %v1633_v29, %v1589_v44 }
 0x21a   :  { %v1774_v1 = vadd.f32 %v1762_v21, %v1706_v27 }
 0x21c   :  { %2109 = vtanh.f32 %v1774_v1 }
 0x21f   :  { %v1697_v32 = vpop.f32.mrf.mxu3  ;;  %v1592_v52 = vpop.f32.mrf.mxu1 }
 0x220   :  { %v1765_v41 = vpop.f32.mrf.mxu2  ;;  %v1707_v63 = vadd.f32 %v1697_v32, %v1634_v61  ;;  %v1636_v9 = vpop.f32.mrf.mxu0 }
 0x221   :  { %v1637_v38 = vadd.f32 %v1636_v9, %v1592_v52 }
 0x222   :  { %v2110_v11 = vpop.eup %2109  ;;  %v1775_v34 = vadd.f32 %v1765_v41, %v1707_v63 }
 0x223   :  { %1782 = vst.msk [vmem:[%s3481_s4 + $0x1c] sm:$0xff] %vm1508_vm3, %v2110_v11 }
 0x224   :  { %2111 = vtanh.f32 %v1775_v34 }
 0x227   :  { %v1700_v51 = vpop.f32.mrf.mxu3  ;;  %v1595_v42 = vpop.f32.mrf.mxu1 }
 0x228   :  { %v1768_v12 = vpop.f32.mrf.mxu2  ;;  %v1708_v40 = vadd.f32 %v1700_v51, %v1637_v38  ;;  %v1639_v50 = vpop.f32.mrf.mxu0 }
 0x229   :  { %v1640_v14 = vadd.f32 %v1639_v50, %v1595_v42 }
 0x22a   :  { %v2112_v13 = vpop.eup %2111  ;;  %v1776_v56 = vadd.f32 %v1768_v12, %v1708_v40 }
 0x22b   :  { %1783 = vst.msk [vmem:[%s3481_s4 + $0x24] sm:$0xff] %vm1508_vm3, %v2112_v13 }
 0x22c   :  { %2113 = vtanh.f32 %v1776_v56 }
 0x22f   :  { %v1703_v48 = vpop.f32.mrf.mxu3 }
 0x230   :  { %v1709_v15 = vadd.f32 %v1703_v48, %v1640_v14  ;;  %v1771_v16 = vpop.f32.mrf.mxu2 }
 0x232   :  { %v2114_v17 = vpop.eup %2113  ;;  %v1777_v43 = vadd.f32 %v1771_v16, %v1709_v15 }
 0x233   :  { %1784 = vst.msk [vmem:[%s3481_s4 + $0x2c] sm:$0xff] %vm1508_vm3, %v2114_v17 }
 0x234   :  { %2115 = vtanh.f32 %v1777_v43 }
 0x23a   :  { %v2116_v18 = vpop.eup %2115 }
 0x23b   :  { %1785 = vst.msk [vmem:[%s3481_s4 + $0x34] sm:$0xf] %vm1512_vm4, %v2116_v18 }

</bundles_post_ra>
